<compile_context>
chip_gen: v7x
topology: tpu7x:2x2x1
jax: 0.10.0
libtpu: 0.0.40
codegen_flags: <defaults>
</compile_context>

<pallas_src>
import numpy as np
import jax
import jax.numpy as jnp
from jax.experimental import pallas as pl
from jax.experimental.pallas import tpu as pltpu


def lraspp_kernel(x_ref, yp_ref, w0_ref, w1_ref, wp_ref, ws_ref, b_ref, o_ref):
    # x_ref: (1, HW, Cx) bf16      yp_ref: (1, HW, Cy) bf16
    # w0/w1: (Cx, 128) bf16        wp: (128, npad) bf16   ws: (Cy, npad) bf16
    # b_ref: (1, npad) f32         o_ref: (1, HW, npad) f32
    x2 = x_ref[0]                                        # (HW, Cx) bf16
    hw = x2.shape[0]

    # ---- branch b0: 1x1 conv (BN folded) + ReLU --------------------------
    feat1 = jnp.maximum(
        jnp.dot(x2, w0_ref[...], preferred_element_type=jnp.float32), 0.0)

    # ---- branch b1: global avg pool -> 1x1 conv -> sigmoid ---------------
    # column sums via a ones-row MXU matmul (exact f32 accumulation of bf16).
    ones_row = jnp.ones((1, hw), dtype=jnp.bfloat16)
    xsum = jnp.dot(ones_row, x2, preferred_element_type=jnp.float32)   # (1, Cx)
    pooled = (xsum * (1.0 / hw)).astype(jnp.bfloat16)
    gate = jax.nn.sigmoid(
        jnp.dot(pooled, w1_ref[...], preferred_element_type=jnp.float32))  # (1, 128)

    # bilinear upsample of a 1x1 map (align_corners=True) == broadcast
    feat = (feat1 * gate).astype(jnp.bfloat16)           # (HW, 128)

    # ---- project conv (128 -> npad) and shortcut conv (Cy -> npad) -------
    proj = jnp.dot(feat, wp_ref[...], preferred_element_type=jnp.float32)
    short = jnp.dot(yp_ref[0], ws_ref[...], preferred_element_type=jnp.float32)

    # single fused bias (bp + bs), lane-dense store
    o_ref[0] = (proj + short + b_ref[...]).astype(o_ref.dtype)


def _pool_matrix_1d(in_size, out_size):
    """1-D adaptive average-pool factor: (out_size, in_size), rows sum to 1."""
    P = np.zeros((out_size, in_size), dtype=np.float32)
    for o in range(out_size):
        a = (o * in_size) // out_size
        b = -((-(o + 1) * in_size) // out_size)
        P[o, a:b] = 1.0 / (b - a)
    return P


def adaptive_avg_pool_nhwc(y_nhwc, out_h, out_w):
    """adaptive_avg_pool2d on an NHWC tensor via separable 1-D pool factors."""
    _, in_h, in_w, _ = y_nhwc.shape
    ph = jnp.asarray(_pool_matrix_1d(in_h, out_h))
    pw = jnp.asarray(_pool_matrix_1d(in_w, out_w))
    hp = jax.lax.Precision.HIGHEST
    t = jnp.einsum("hu,nuvc->nhvc", ph, y_nhwc, precision=hp)
    return jnp.einsum("wv,nhvc->nhwc", pw, t, precision=hp)


def lraspp_v2_forward(x_nchw, y_nchw, params, nclass):
    N, Cx, H, W = x_nchw.shape
    _, Cy, H2, W2 = y_nchw.shape
    HW = H * W
    npad = max(128, ((nclass + 127) // 128) * 128)       # lane-dense class dim

    # ---- layout / dtype glue ---------------------------------------------
    xf = jnp.transpose(x_nchw, (0, 2, 3, 1)).reshape(N, HW, Cx).astype(jnp.bfloat16)

    # adaptive average pool of the shortcut feature as separable 1-D factors
    # (linear, commutes with the 1x1 shortcut conv).  Done as cheap XLA glue
    # so the kernel never holds a dense (HW, H2*W2) pooling matrix in VMEM.
    y_nhwc = jnp.transpose(y_nchw, (0, 2, 3, 1))
    y_pool = adaptive_avg_pool_nhwc(y_nhwc, H, W).reshape(N, HW, Cy)
    y_pool = y_pool.astype(jnp.bfloat16)

    # zero-pad the class dim of the small convs to a full 128-lane width and
    # fold the two biases into one (pool rows sum to 1, so this is exact).
    wp_pad = jnp.zeros((params["wp"].shape[0], npad), jnp.float32)
    wp_pad = wp_pad.at[:, :nclass].set(params["wp"]).astype(jnp.bfloat16)
    ws_pad = jnp.zeros((params["ws"].shape[0], npad), jnp.float32)
    ws_pad = ws_pad.at[:, :nclass].set(params["ws"]).astype(jnp.bfloat16)
    b_pad = jnp.zeros((1, npad), jnp.float32).at[:, :nclass].set(
        params["bp"] + params["bs"])

    w0b = params["w0"].astype(jnp.bfloat16)
    w1b = params["w1"].astype(jnp.bfloat16)

    # TODO(synk): for very large H*W, tile the spatial axis (grid=(N, HW//T))
    # with the sigmoid gate precomputed in a prepass so the bf16 x slab never
    # exceeds VMEM; at these head sizes a whole image per grid step is fine.
    out_flat = pl.pallas_call(
        lraspp_kernel,
        out_shape=jax.ShapeDtypeStruct((N, HW, npad), jnp.float32),
        grid_spec=pltpu.PrefetchScalarGridSpec(
            num_scalar_prefetch=0,
            grid=(N,),
            in_specs=[
                pl.BlockSpec((1, HW, Cx), lambda n: (n, 0, 0)),   # x
                pl.BlockSpec((1, HW, Cy), lambda n: (n, 0, 0)),   # pooled y
                pl.BlockSpec((Cx, 128), lambda n: (0, 0)),        # w0
                pl.BlockSpec((Cx, 128), lambda n: (0, 0)),        # w1
                pl.BlockSpec((128, npad), lambda n: (0, 0)),      # wp (padded)
                pl.BlockSpec((Cy, npad), lambda n: (0, 0)),       # ws (padded)
                pl.BlockSpec((1, npad), lambda n: (0, 0)),        # fused bias
            ],
            out_specs=pl.BlockSpec((1, HW, npad), lambda n: (n, 0, 0)),
        ),
        compiler_params=pltpu.CompilerParams(
            dimension_semantics=("parallel",)),
    )(xf, y_pool, w0b, w1b, wp_pad, ws_pad, b_pad)

    # glue: strip the lane padding, back to NCHW
    out = out_flat[:, :, :nclass].reshape(N, H, W, nclass)
    return jnp.transpose(out, (0, 3, 1, 2))


def _bf16(a):
    return a.astype(jnp.bfloat16).astype(jnp.float32)


def reference_forward(x_nchw, y_nchw, params, nclass):
    """Pure-JAX reference with the same bf16 operand rounding as the kernel."""
    N, Cx, H, W = x_nchw.shape
    _, Cy, H2, W2 = y_nchw.shape
    HW = H * W
    hp = jax.lax.Precision.HIGHEST

    xf = _bf16(jnp.transpose(x_nchw, (0, 2, 3, 1)).reshape(N, HW, Cx))
    w0 = _bf16(params["w0"]); w1 = _bf16(params["w1"])
    wp = _bf16(params["wp"]); ws = _bf16(params["ws"])

    feat1 = jax.nn.relu(jnp.einsum("nsc,cd->nsd", xf, w0, precision=hp))
    pooled = _bf16(jnp.mean(xf, axis=1))
    gate = jax.nn.sigmoid(jnp.einsum("nc,cd->nd", pooled, w1, precision=hp))
    feat = _bf16(feat1 * gate[:, None, :])
    proj = jnp.einsum("nsd,dk->nsk", feat, wp, precision=hp)

    y_nhwc = jnp.transpose(y_nchw, (0, 2, 3, 1))
    y_pool = _bf16(adaptive_avg_pool_nhwc(y_nhwc, H, W).reshape(N, HW, Cy))
    short = jnp.einsum("npc,ck->npk", y_pool, ws, precision=hp)

    out = proj + short + (params["bp"] + params["bs"])
    return jnp.transpose(out.reshape(N, H, W, nclass), (0, 3, 1, 2))


def init_params(key, nclass):
    """Deterministic init mirroring the PyTorch init_params (kaiming fan_out,
    zero bias, BN gamma=1/beta=0; eval-mode running stats folded into w0)."""
    k0, k1, k2, k3 = jax.random.split(key, 4)
    bn_eps = 1e-5
    bn_scale = 1.0 / jnp.sqrt(1.0 + bn_eps)          # gamma / sqrt(var + eps)

    def kaiming(k, cin, cout):                       # weight stored as (Cin, Cout)
        std = np.sqrt(2.0 / cout)                    # fan_out for a 1x1 conv
        return jax.random.normal(k, (cin, cout), jnp.float32) * std

    w0 = kaiming(k0, 1280, 128) * bn_scale           # b0 conv, BN folded
    w1 = kaiming(k1, 1280, 128)                      # b1 conv
    wp = kaiming(k2, 128, nclass)                    # project conv
    ws = kaiming(k3, 32, nclass)                     # shortcut conv
    bp = jnp.zeros((1, nclass), jnp.float32)
    bs = jnp.zeros((1, nclass), jnp.float32)
    return dict(w0=w0, w1=w1, wp=wp, bp=bp, ws=ws, bs=bs)


if __name__ == "__main__":
    nclass = 2
    N, H, W = 2, 8, 8          # x spatial
    H2, W2 = 16, 16            # y spatial (higher-res shortcut feature)

    key = jax.random.PRNGKey(0)
    kx, ky, kp = jax.random.split(key, 3)
    x = jax.random.normal(kx, (N, 1280, H, W), jnp.float32)   # NCHW like PyTorch
    y = jax.random.normal(ky, (N, 32, H2, W2), jnp.float32)
    params = init_params(kp, nclass)

    out = lraspp_v2_forward(x, y, params, nclass)
    out = jax.block_until_ready(out)

    ref = reference_forward(x, y, params, nclass)
    assert out.shape == (N, nclass, H, W)
    np.testing.assert_allclose(np.asarray(out), np.asarray(ref),
                               rtol=1e-2, atol=1e-2)
    print("KERNEL_OK")
</pallas_src>

<mosaic_0001>
module attributes {stable_mosaic.version = 11 : i64} {
  func.func @lraspp_kernel(%arg0: i32, %arg1: memref<1x64x1280xbf16, #tpu.memory_space<vmem>>, %arg2: memref<1x64x32xbf16, #tpu.memory_space<vmem>>, %arg3: memref<1280x128xbf16, #tpu.memory_space<vmem>>, %arg4: memref<1280x128xbf16, #tpu.memory_space<vmem>>, %arg5: memref<128x128xbf16, #tpu.memory_space<vmem>>, %arg6: memref<32x128xbf16, #tpu.memory_space<vmem>>, %arg7: memref<1x128xf32, #tpu.memory_space<vmem>>, %arg8: memref<1x64x128xf32, #tpu.memory_space<vmem>>) attributes {dimension_semantics = [#tpu.dimension_semantics<parallel>], iteration_bounds = array<i64: 2>, scalar_prefetch = 0 : i64, scratch_operands = 0 : i64, tpu.core_type = #tpu.core_type<tc>, window_params = [{transform_indices = @transform_0, window_bounds = array<i64: 1, 64, 1280>}, {transform_indices = @transform_1, window_bounds = array<i64: 1, 64, 32>}, {pipeline_mode = #tpu.pipeline_mode<synchronous>, transform_indices = @transform_2, window_bounds = array<i64: 1280, 128>}, {pipeline_mode = #tpu.pipeline_mode<synchronous>, transform_indices = @transform_3, window_bounds = array<i64: 1280, 128>}, {pipeline_mode = #tpu.pipeline_mode<synchronous>, transform_indices = @transform_4, window_bounds = array<i64: 128, 128>}, {pipeline_mode = #tpu.pipeline_mode<synchronous>, transform_indices = @transform_5, window_bounds = array<i64: 32, 128>}, {pipeline_mode = #tpu.pipeline_mode<synchronous>, transform_indices = @transform_6, window_bounds = array<i64: 1, 128>}, {transform_indices = @transform_7, window_bounds = array<i64: 1, 64, 128>}]} {
    %c0 = arith.constant 0 : index
    %c0_0 = arith.constant 0 : index
    %c0_1 = arith.constant 0 : index
    %0 = vector.load %arg1[%c0, %c0_0, %c0_1] : memref<1x64x1280xbf16, #tpu.memory_space<vmem>>, vector<1x64x1280xbf16>
    %1 = vector.shape_cast %0 : vector<1x64x1280xbf16> to vector<64x1280xbf16>
    %c0_2 = arith.constant 0 : index
    %c0_3 = arith.constant 0 : index
    %2 = vector.load %arg3[%c0_2, %c0_3] : memref<1280x128xbf16, #tpu.memory_space<vmem>>, vector<1280x128xbf16>
    %cst = arith.constant dense<0.000000e+00> : vector<64x128xf32>
    %3 = tpu.matmul %1, %2, %cst {dimension_numbers = #tpu.dot_dimension_numbers<[1], [0], [0], [1], [0, 0, 1, 1], [], []>} : vector<64x1280xbf16>, vector<1280x128xbf16>, vector<64x128xf32> -> vector<64x128xf32>
    %cst_4 = arith.constant 0.000000e+00 : f32
    %4 = vector.broadcast %cst_4 : f32 to vector<64x128xf32>
    %5 = arith.maximumf %3, %4 : vector<64x128xf32>
    %cst_5 = arith.constant 1.000000e+00 : bf16
    %6 = vector.broadcast %cst_5 : bf16 to vector<1x64xbf16>
    %cst_6 = arith.constant dense<0.000000e+00> : vector<1x1280xf32>
    %7 = tpu.matmul %6, %1, %cst_6 {dimension_numbers = #tpu.dot_dimension_numbers<[1], [0], [0], [1], [0, 0, 1, 1], [], []>} : vector<1x64xbf16>, vector<64x1280xbf16>, vector<1x1280xf32> -> vector<1x1280xf32>
    %cst_7 = arith.constant 1.562500e-02 : f32
    %8 = vector.broadcast %cst_7 : f32 to vector<1x1280xf32>
    %9 = arith.mulf %7, %8 : vector<1x1280xf32>
    %10 = arith.truncf %9 : vector<1x1280xf32> to vector<1x1280xbf16>
    %c0_8 = arith.constant 0 : index
    %c0_9 = arith.constant 0 : index
    %11 = vector.load %arg4[%c0_8, %c0_9] : memref<1280x128xbf16, #tpu.memory_space<vmem>>, vector<1280x128xbf16>
    %cst_10 = arith.constant dense<0.000000e+00> : vector<1x128xf32>
    %12 = tpu.matmul %10, %11, %cst_10 {dimension_numbers = #tpu.dot_dimension_numbers<[1], [0], [0], [1], [0, 0, 1, 1], [], []>} : vector<1x1280xbf16>, vector<1280x128xbf16>, vector<1x128xf32> -> vector<1x128xf32>
    %13 = arith.negf %12 : vector<1x128xf32>
    %14 = math.exp %13 : vector<1x128xf32>
    %cst_11 = arith.constant 1.000000e+00 : f32
    %15 = vector.broadcast %cst_11 : f32 to vector<1x128xf32>
    %16 = arith.addf %15, %14 : vector<1x128xf32>
    %17 = arith.divf %15, %16 : vector<1x128xf32>
    %18 = vector.broadcast %17 : vector<1x128xf32> to vector<64x128xf32>
    %19 = arith.mulf %5, %18 : vector<64x128xf32>
    %20 = arith.truncf %19 : vector<64x128xf32> to vector<64x128xbf16>
    %c0_12 = arith.constant 0 : index
    %c0_13 = arith.constant 0 : index
    %21 = vector.load %arg5[%c0_12, %c0_13] : memref<128x128xbf16, #tpu.memory_space<vmem>>, vector<128x128xbf16>
    %cst_14 = arith.constant dense<0.000000e+00> : vector<64x128xf32>
    %22 = tpu.matmul %20, %21, %cst_14 {dimension_numbers = #tpu.dot_dimension_numbers<[1], [0], [0], [1], [0, 0, 1, 1], [], []>} : vector<64x128xbf16>, vector<128x128xbf16>, vector<64x128xf32> -> vector<64x128xf32>
    %c0_15 = arith.constant 0 : index
    %c0_16 = arith.constant 0 : index
    %c0_17 = arith.constant 0 : index
    %23 = vector.load %arg2[%c0_15, %c0_16, %c0_17] : memref<1x64x32xbf16, #tpu.memory_space<vmem>>, vector<1x64x32xbf16>
    %24 = vector.shape_cast %23 : vector<1x64x32xbf16> to vector<64x32xbf16>
    %c0_18 = arith.constant 0 : index
    %c0_19 = arith.constant 0 : index
    %25 = vector.load %arg6[%c0_18, %c0_19] : memref<32x128xbf16, #tpu.memory_space<vmem>>, vector<32x128xbf16>
    %cst_20 = arith.constant dense<0.000000e+00> : vector<64x128xf32>
    %26 = tpu.matmul %24, %25, %cst_20 {dimension_numbers = #tpu.dot_dimension_numbers<[1], [0], [0], [1], [0, 0, 1, 1], [], []>} : vector<64x32xbf16>, vector<32x128xbf16>, vector<64x128xf32> -> vector<64x128xf32>
    %27 = arith.addf %22, %26 : vector<64x128xf32>
    %c0_21 = arith.constant 0 : index
    %c0_22 = arith.constant 0 : index
    %28 = vector.load %arg7[%c0_21, %c0_22] : memref<1x128xf32, #tpu.memory_space<vmem>>, vector<1x128xf32>
    %29 = vector.broadcast %28 : vector<1x128xf32> to vector<64x128xf32>
    %30 = arith.addf %27, %29 : vector<64x128xf32>
    %c0_23 = arith.constant 0 : index
    %c0_24 = arith.constant 0 : index
    %c0_25 = arith.constant 0 : index
    %31 = vector.load %arg8[%c0_23, %c0_24, %c0_25] : memref<1x64x128xf32, #tpu.memory_space<vmem>>, vector<1x64x128xf32>
    %32 = vector.shape_cast %31 : vector<1x64x128xf32> to vector<64x128xf32>
    %33 = vector.shape_cast %30 : vector<64x128xf32> to vector<1x64x128xf32>
    tpu.vector_store %arg8[%c0_23, %c0_24, %c0_25], %33 {strides = array<i32>} : memref<1x64x128xf32, #tpu.memory_space<vmem>>, vector<1x64x128xf32>,
    return
  }
  func.func @transform_0(%arg0: i32) -> (i32, i32, i32) {
    %c0_i32 = arith.constant 0 : i32
    %c0_i32_0 = arith.constant 0 : i32
    %c0_i32_1 = arith.constant 0 : i32
    return %arg0, %c0_i32, %c0_i32_0 : i32, i32, i32
  }
  func.func @transform_1(%arg0: i32) -> (i32, i32, i32) {
    %c0_i32 = arith.constant 0 : i32
    %c0_i32_0 = arith.constant 0 : i32
    %c0_i32_1 = arith.constant 0 : i32
    return %arg0, %c0_i32, %c0_i32_0 : i32, i32, i32
  }
  func.func @transform_2(%arg0: i32) -> (i32, i32) {
    %c0_i32 = arith.constant 0 : i32
    %c0_i32_0 = arith.constant 0 : i32
    %c0_i32_1 = arith.constant 0 : i32
    return %c0_i32, %c0_i32_0 : i32, i32
  }
  func.func @transform_3(%arg0: i32) -> (i32, i32) {
    %c0_i32 = arith.constant 0 : i32
    %c0_i32_0 = arith.constant 0 : i32
    %c0_i32_1 = arith.constant 0 : i32
    return %c0_i32, %c0_i32_0 : i32, i32
  }
  func.func @transform_4(%arg0: i32) -> (i32, i32) {
    %c0_i32 = arith.constant 0 : i32
    %c0_i32_0 = arith.constant 0 : i32
    %c0_i32_1 = arith.constant 0 : i32
    return %c0_i32, %c0_i32_0 : i32, i32
  }
  func.func @transform_5(%arg0: i32) -> (i32, i32) {
    %c0_i32 = arith.constant 0 : i32
    %c0_i32_0 = arith.constant 0 : i32
    %c0_i32_1 = arith.constant 0 : i32
    return %c0_i32, %c0_i32_0 : i32, i32
  }
  func.func @transform_6(%arg0: i32) -> (i32, i32) {
    %c0_i32 = arith.constant 0 : i32
    %c0_i32_0 = arith.constant 0 : i32
    %c0_i32_1 = arith.constant 0 : i32
    return %c0_i32, %c0_i32_0 : i32, i32
  }
  func.func @transform_7(%arg0: i32) -> (i32, i32, i32) {
    %c0_i32 = arith.constant 0 : i32
    %c0_i32_0 = arith.constant 0 : i32
    %c0_i32_1 = arith.constant 0 : i32
    return %arg0, %c0_i32, %c0_i32_0 : i32, i32, i32
  }
}

</mosaic_0001>

<bundles_post_ra>
// kernel: tpu_custom_call.1
= control target key start
LH: loop header
LB: loop body
LE: loop exit
PB: predicated region body
PF: predicated region fallthrough
CT: control target
= control target key end

     0   :  { %s4679_s0 = inlined_call_operand.hbm [shape: bf16[2,64,1280], index: 0, kind: input, shape index: {}]   ;;  %s4680_s1 = inlined_call_operand.vmem [shape: bf16[2,64,32], index: 1, kind: input, shape index: {}]   ;;  %s4681_s2 = inlined_call_operand.hbm [shape: bf16[1280,128], index: 2, kind: input, shape index: {}]   ;;  %s4682_s3 = inlined_call_operand.hbm [shape: bf16[1280,128], index: 3, kind: input, shape index: {}]   ;;  %s4683_s4 = inlined_call_operand.vmem [shape: bf16[128,128], index: 4, kind: input, shape index: {}]   ;;  %s4684_s5 = inlined_call_operand.vmem [shape: bf16[32,128], index: 5, kind: input, shape index: {}]   ;;  %s4685_s6 = inlined_call_operand.vmem [shape: f32[1,128], index: 6, kind: input, shape index: {}]   ;;  %s4686_s7 = inlined_call_operand.hbm [shape: f32[2,64,128], index: 7, kind: output, shape index: {}]  }
   0x1   :  { %4690 = sst [smem:[#allocation12_spill]] %s4681_s2 }
   0x2   :  { %12 = vsyncpa [#allocation3], 0 }
   0x3   :  { %14 = vsyncpa [#allocation3 + $0x1], 0 }
   0x4   :  { %15 = vsyncpa [#allocation6], 0 }
   0x5   :  { %16 = vsyncpa [#allocation4], 0 }
   0x6   :  { %18 = vsyncpa [#allocation4 + $0x1], 0  ;;  %s4202_s24 = smov 0   ;;  %s4204_s25 = smov 0  }
   0x7   :  { %s4206_s26 = smov 0   ;;  %s4208_s27 = smov 0  }
   0x8 LB: > { %s4223_s28 = sadd.s32 4294967295, %s4148_s27   ;;  %s3044_s29 = sadd.s32 4294967294, %s4148_s27   ;;  %s4148_s27 = sphi %s4208_s27, %s4708_s27   ;;  %s4144_s26 = sphi %s4206_s26, %s4707_s26   ;;  %s4140_s25 = sphi %s4204_s25, %s4706_s25   ;;  %s4136_s24 = sphi %s4202_s24, %s4705_s24  }
   0x9   : > { %p44_p0 = scmp.ne.s32.totalorder %s4140_s25, %s4136_s24  ;;  %p4687_p1 = scmp.eq.s32.totalorder %s4223_s28, 0 }
   0xa   : > { %p205_p3 = scmp.eq.s32.totalorder %s3044_s29, 1  ;;  %p3045_p5 = scmp.ge.s32.totalorder %s4148_s27, 1 }
   0xb   : > { %p4232_p4 = por %p4687_p1, %p44_p0  ;;  %p212_p7 = scmp.lt.s32.totalorder %s4148_s27, 3 }
   0xc   : > { %p4237_p6 = por %p205_p3, %p44_p0  ;;  %s4150_s10 = smov [#allocation5]  }
   0xd   : > { %s4691_s30 = scalar_select %p4232_p4, 1, 0 }
   0xe   : > { %s4692_s8 = scalar_select %p4237_p6, 1, 0 }
   0xf   : > { %p4242_p8 = pnand %p3045_p5, %p212_p7  ;;  %s224_s11 = sshll.u32 %s4150_s10, 4  ;;  %s4246_s11 = int_to_ptr.vmem [resolvable:$true] %s224_s11 }
  0x10   : > { %s4151_s13 = smov [#allocation7]   ;;  %s4695_s2 = sld [smem:[#allocation12_spill]] }
  0x11   : > { %p3691_p9 = pneg %p4242_p8  ;;  %s237_s14 = sshll.u32 %s4151_s13, 4  ;;  %s4257_s14 = int_to_ptr.vmem [resolvable:$true] %s237_s14 }
  0x13   : > { %p4253_p11 = pnand %p3691_p9, %p4687_p1 }
  0x15   : > { %p3994_p13 = pneg %p4253_p11 }
  0x16   : > { %s3992_s17 = scalar_lea.hbm %s4695_s2, 10240 }
  0x17   : > { %p3993_p12 = scmp.ne.s32.totalorder %s4695_s2, %s3992_s17  ;;  %p3999_p5 = scmp.lt.u32.totalorder %s3992_s17, %s4695_s2 }
  0x19   : > { %p3995_p0 = pnand %p3994_p13, %p3993_p12 }
  0x1b   : > { %p3996_p3 = pneg %p3995_p0 }
  0x1d   : > { %p4001_p7 = pnand %p3999_p5, %p3996_p3 }
  0x1f   : > { %4004 = shalt.err (!%p4001_p7)
}
  0x20   : > { %s4005_s22 = scalar_lea.vmem %s4246_s11, 10240  ;;  %p4013_p2 = scmp.lt.s32.totalorder %s4246_s11, %s4246_s11 }
  0x21   : > { %p4006_p9 = scmp.ne.s32.totalorder %s4246_s11, %s4005_s22  ;;  %p4014_p12 = scmp.lt.s32.totalorder %s4005_s22, %s4005_s22 }
  0x23   : > { %p4008_p10 = pnand %p4006_p9, %p3994_p13  ;;  %p4015_p0 = por %p4014_p12, %p4013_p2 }
  0x25   : > { %p4009_p1 = pneg %p4008_p10 }
  0x27   : > { %p4016_p6 = pnand %p4015_p0, %p4009_p1 }
  0x29   : > { %4019 = shalt.err (!%p4016_p6)
}
  0x2a   : > { %s4152_s23 = smov 64   ;;  %s4153_s29 = smov 4  }
  0x2b   : > { %3694 = dma.hbm_to_vmem [thread:$0]  (!%p4253_p11), %s4695_s2, 10240, %s4246_s11, [#allocation6], %s4152_s23, %s4152_s23, %s4153_s29  }
  0x2c   : > { %s4020_s17 = scalar_lea.hbm %s4682_s3, 10240 }
  0x2d   : > { %p4021_p2 = scmp.ne.s32.totalorder %s4682_s3, %s4020_s17  ;;  %p4027_p10 = scmp.lt.u32.totalorder %s4020_s17, %s4682_s3 }
  0x2f   : > { %p4023_p1 = pnand %p4021_p2, %p3994_p13 }
  0x31   : > { %p4024_p6 = pneg %p4023_p1 }
  0x33   : > { %p4029_p3 = pnand %p4027_p10, %p4024_p6 }
  0x35   : > { %4032 = shalt.err (!%p4029_p3)
}
  0x36   : > { %s4033_s11 = scalar_lea.vmem %s4257_s14, 10240  ;;  %p4041_p12 = scmp.lt.s32.totalorder %s4257_s14, %s4257_s14 }
  0x37   : > { %p4034_p5 = scmp.ne.s32.totalorder %s4257_s14, %s4033_s11  ;;  %p4042_p0 = scmp.lt.s32.totalorder %s4033_s11, %s4033_s11 }
  0x39   : > { %p4036_p7 = pnand %p4034_p5, %p3994_p13  ;;  %p4043_p2 = por %p4042_p0, %p4041_p12 }
  0x3b   : > { %p4037_p9 = pneg %p4036_p7 }
  0x3d   : > { %p4044_p1 = pnand %p4043_p2, %p4037_p9 }
  0x3f   : > { %4047 = shalt.err (!%p4044_p1)
}
  0x40   : > { %3697 = dma.hbm_to_vmem [thread:$0]  (!%p4253_p11), %s4682_s3, 10240, %s4257_s14, [#allocation6], %s4152_s23, %s4152_s23, %s4153_s29  }
  0x41   : > { %s4312_s13 = sadd.s32 1, %s4148_s27   ;;  %s31_s12 = sadd.s32 1, %s4144_s26 }
  0x42   : > { %s28_s15 = ssub.s32 %s4148_s27, %s4312_s13  ;;  %p38_p13 = scmp.ne.s32.totalorder %s4144_s26, %s4140_s25 }
  0x43   : > { %p29_p6 = scmp.eq.s32.totalorder %s28_s15, 0  ;;  %p39_p10 = scmp.eq.s32.totalorder %s4148_s27, 0 }
  0x44   : > { %p4696_p3 = scmp.eq.s32.totalorder %s4223_s28, 1  ;;  %p3708_p7 = scmp.lt.s32.totalorder %s4148_s27, 2 }
  0x45   : > { %s4328_s17 = scalar_select %p29_p6, %s4144_s26, %s31_s12  }
  0x46   : > { %p4322_p5 = por %p4696_p3, %p38_p13  ;;  %p40_p9 = por %p39_p10, %p38_p13 }
  0x47   : > { %s260_s18 = sand.u32 1, %s4144_s26   ;;  %s3677_s14 = smul.u32 5120, %s4148_s27 }
  0x48   : > { %s4697_s16 = scalar_select %p4322_p5, 1, 0 }
  0x49   : > { %s3676_s19 = smul.u32 320, %s260_s18  ;;  %p4332_p11 = pnand %p3708_p7, %p40_p9 }
  0x4a   : > { %s4339_s21 = scalar_lea.hbm %s4679_s0, %s3677_s14  ;;  %s4343_s10 = scalar_lea.sflag [#allocation3], %s260_s18 }
  0x4b   : > { %s264_s11 = scalar_lea.vmem [#allocation2], %s3676_s19  ;;  %s4048_s12 = scalar_lea.hbm %s4339_s21, 5120 }
  0x4c   : > { %s271_s22 = sshll.u32 %s264_s11, 4  ;;  %p4049_p12 = scmp.ne.s32.totalorder %s4339_s21, %s4048_s12  ;;  %s4341_s22 = int_to_ptr.vmem [resolvable:$true] %s271_s22 }
  0x4d   : > { %p4050_p0 = pneg %p4332_p11  ;;  %s4053_s29 = scalar_lea.hbm %s4679_s0, 10240 }
  0x4e   : > { %p4054_p13 = scmp.lt.u32.totalorder %s4339_s21, %s4679_s0  ;;  %p4055_p6 = scmp.lt.u32.totalorder %s4053_s29, %s4048_s12 }
  0x4f   : > { %p4051_p2 = pnand %p4050_p0, %p4049_p12  ;;  %p4057_p3 = scmp.lt.u32.totalorder %s4048_s12, %s4339_s21 }
  0x50   : > { %p4056_p10 = por %p4055_p6, %p4054_p13 }
  0x51   : > { %p4052_p1 = pneg %p4051_p2 }
  0x52   : > { %p4058_p7 = por %p4057_p3, %p4056_p10 }
  0x54   : > { %p4059_p9 = pnand %p4058_p7, %p4052_p1 }
  0x56   : > { %4062 = shalt.err (!%p4059_p9)
}
  0x57   : > { %s4063_s18 = scalar_lea.vmem %s4341_s22, 5120  ;;  %s4154_s19 = smov [#allocation2]  }
  0x58   : > { %p4064_p12 = scmp.ne.s32.totalorder %s4341_s22, %s4063_s18  ;;  %s4068_s11 = sshll.u32 %s4154_s19, 4  ;;  %s4069_s11 = int_to_ptr.vmem [resolvable:$false] %s4068_s11 }
  0x59   : > { %s4070_s2 = scalar_lea.vmem %s4069_s11, 10240  ;;  %p4071_p4 = scmp.lt.s32.totalorder %s4341_s22, %s4069_s11 }
  0x5a   : > { %p4066_p2 = pnand %p4064_p12, %p4050_p0  ;;  %p4072_p13 = scmp.lt.s32.totalorder %s4070_s2, %s4063_s18 }
  0x5c   : > { %p4067_p5 = pneg %p4066_p2  ;;  %p4073_p6 = por %p4072_p13, %p4071_p4 }
  0x5e   : > { %p4074_p10 = pnand %p4073_p6, %p4067_p5 }
  0x60   : > { %4077 = shalt.err (!%p4074_p10)
}
  0x61   : > { %s4155_s12 = smov 640   ;;  %s4156_s15 = smov 40  }
  0x62   : > { %3701 = dma.hbm_to_vmem [thread:$0]  (!%p4332_p11), %s4339_s21, 5120, %s4341_s22, %s4343_s10, %s4155_s12, %s4155_s12, %s4156_s15  }
  0x63   : > { %291 = sbr.rel (%p4242_p8) target bundleno = 998 (0x3e6), region = 48  ;;  %s4374_s14 = sand.u32 (!%p4242_p8), 1, %s4140_s25  }
  0x64   : > { %s3678_s29 = smul.u32 (!%p4242_p8), 320, %s4374_s14  ;;  %s294_s20 = scalar_lea.sflag (!%p4242_p8), [#allocation3], %s4374_s14 }
  0x65   : > { %p4699_p4 = scmp.ne.s32.totalorder (!%p4242_p8), %s4691_s30, 0 }
  0x66   : > { %s4378_s18 = scalar_lea.vmem (!%p4242_p8), [#allocation2], %s3678_s29 }
  0x6a   : > { %4123 = dma.done.wait (%p4699_p4), %s294_s20, 5120  }
  0x6b   : > { %4125 = vsyncadd (%p4699_p4), %s294_s20, 4294962176  ;;  %p4700_p5 = scmp.eq.s32.totalorder %s4223_s28, 0 }
  0x6d   : > { %4127 = dma.done.wait (%p4700_p5), [#allocation6], 20480   ;;  %p4701_p8 = pmov %p4700_p5 }
  0x6e   : > { %v3754_v0 = vld [vmem:[#allocation5 + $0x40] sm:$0xff]   ;;  %v3758_v4 = vld [vmem:[#allocation5 + $0x48] sm:$0xff]   ;;  %v3762_v8 = vld [vmem:[#allocation5 + $0x50] sm:$0xff]   ;;  %vm1561_vm0 = vcmask 523264   ;;  %p341_p11 = scmp.lt.s32.totalorder %s4223_s28, 1  ;;  %vm2712_vm1 = vcmask 261120  }
  0x6f   : > { %4129 = vsyncadd (%p4701_p8), [#allocation6], 4294946816  ;;  %v3755_v1 = vld [vmem:[#allocation5 + $0xc0] sm:$0xff]   ;;  %3288 = vmatprep.subr.bf16.mxu0 %v3754_v0  ;;  %v3759_v5 = vld [vmem:[#allocation5 + $0xc8] sm:$0xff]   ;;  %s3287_s23 = sshll.u32 %s4223_s28, 10  ;;  %p4702_p1 = scmp.ne.s32.totalorder %s4697_s16, 0 }
  0x70   : > { %v3756_v2 = vld [vmem:[#allocation5] sm:$0xff]   ;;  %3328 = vmatprep.subr.bf16.mxu1 %v3755_v1  ;;  %v3760_v6 = vld [vmem:[#allocation5 + $0x8] sm:$0xff]   ;;  %v3763_v9 = vld [vmem:[#allocation5 + $0xd0] sm:$0xff]   ;;  %s342_s22 = scalar_select %p341_p11, %s4223_s28, 1 }
  0x71   : > { %v3757_v3 = vld [vmem:[#allocation5 + $0x80] sm:$0xff]   ;;  %3289 = vmatpush3.bf16.msra.mxu0 %v3756_v2  ;;  %v3761_v7 = vld [vmem:[#allocation5 + $0x88] sm:$0xff]   ;;  %v3764_v10 = vld [vmem:[#allocation5 + $0x10] sm:$0xff]   ;;  %s2927_s28 = scalar_lea.sflag [#allocation4], %s4374_s14  ;;  %s4159_s11 = smov [#allocation8]  }
  0x72   : > { %3329 = vmatpush3.bf16.msra.mxu1 %v3757_v3  ;;  %3290 = vmatprep.subr.bf16.mxu0 %v3758_v4  ;;  %v3765_v11 = vld [vmem:[#allocation5 + $0x90] sm:$0xff]   ;;  %v3766_v12 = vld [vmem:[#allocation5 + $0x58] sm:$0xff]   ;;  %v3770_v16 = vld [vmem:[#allocation5 + $0x60] sm:$0xff]   ;;  %s3286_s10 = sshll.u32 %s342_s22, 5  ;;  %s4082_s12 = sshll.u32 %s4159_s11, 4  ;;  %s4083_s12 = int_to_ptr.vmem [resolvable:$false] %s4082_s12 }
  0x73   : > { %3330 = vmatprep.subr.bf16.mxu1 %v3759_v5  ;;  %v3767_v13 = vld [vmem:[#allocation5 + $0xd8] sm:$0xff]   ;;  %v3771_v17 = vld [vmem:[#allocation5 + $0xe0] sm:$0xff]   ;;  %v3774_v20 = vld [vmem:[#allocation5 + $0x68] sm:$0xff]   ;;  %s345_s2 = scalar_lea.vmem %s4680_s1, %s3286_s10  ;;  %s4635_s10 = scalar_lea.hbm %s4686_s7, %s3287_s23 }
  0x74   : > { %v3768_v14 = vld [vmem:[#allocation5 + $0x18] sm:$0xff]   ;;  %v3772_v18 = vld [vmem:[#allocation5 + $0x20] sm:$0xff]   ;;  %v3775_v21 = vld [vmem:[#allocation5 + $0xe8] sm:$0xff]   ;;  %s4084_s15 = scalar_lea.vmem %s4083_s12, 2048 }
  0x75   : > { %3291 = vmatpush3.bf16.msra.mxu0 %v3760_v6  ;;  %v3769_v15 = vld [vmem:[#allocation5 + $0x98] sm:$0xff]   ;;  %v3773_v19 = vld [vmem:[#allocation5 + $0xa0] sm:$0xff]   ;;  %v3776_v22 = vld [vmem:[#allocation5 + $0x28] sm:$0xff]  }
  0x76   : > { %3331 = vmatpush3.bf16.msra.mxu1 %v3761_v7  ;;  %3292 = vmatprep.subr.bf16.mxu0 %v3762_v8  ;;  %v3777_v23 = vld [vmem:[#allocation5 + $0xa8] sm:$0xff]   ;;  %v3778_v24 = vld [vmem:[#allocation5 + $0x70] sm:$0xff]   ;;  %v3782_v28 = vld [vmem:[#allocation5 + $0x78] sm:$0xff]  }
  0x77   : > { %3332 = vmatprep.subr.bf16.mxu1 %v3763_v9  ;;  %v3779_v25 = vld [vmem:[#allocation5 + $0xf0] sm:$0xff]   ;;  %v3783_v29 = vld [vmem:[#allocation5 + $0xf8] sm:$0xff]   ;;  %v4389_v32 = vld [vmem:[%s4378_s18] ss:$40 sps:$4 sm:$0xff]  }
  0x78   : > { %v3780_v26 = vld [vmem:[#allocation5 + $0x30] sm:$0xff]   ;;  %v3784_v30 = vld [vmem:[#allocation5 + $0x38] sm:$0xff]   ;;  %v4392_v33 = vld [vmem:[%s4378_s18 + $0x4] ss:$40 sps:$4 sm:$0xff]  }
  0x79   : > { %3293 = vmatpush3.bf16.msra.mxu0 %v3764_v10  ;;  %v3781_v27 = vld [vmem:[#allocation5 + $0xb0] sm:$0xff]   ;;  %v3785_v31 = vld [vmem:[#allocation5 + $0xb8] sm:$0xff]   ;;  %1260 = vmatprep.mubr.bf16.mxu0 %v4392_v33  ;;  %v3792_v36 = vld [vmem:[#allocation5 + $0x140] sm:$0xff]  }
  0x7a   : > { %3333 = vmatpush3.bf16.msra.mxu1 %v3765_v11  ;;  %3294 = vmatprep.subr.bf16.mxu0 %v3766_v12  ;;  %v4395_v34 = vld [vmem:[%s4378_s18 + $0x8] ss:$40 sps:$4 sm:$0xff]   ;;  %v4398_v35 = vld [vmem:[%s4378_s18 + $0xc] ss:$40 sps:$4 sm:$0xff]   ;;  %v3793_v37 = vld [vmem:[#allocation5 + $0x1c0] sm:$0xff]  }
  0x7b   : > { %3334 = vmatprep.subr.bf16.mxu1 %v3767_v13  ;;  %1325 = vmatprep.mubr.bf16.mxu1 %v4398_v35  ;;  %v3794_v38 = vld [vmem:[#allocation5 + $0x100] sm:$0xff]   ;;  %v3796_v40 = vld [vmem:[#allocation5 + $0x148] sm:$0xff]   ;;  %v4405_v44 = vld [vmem:[%s4378_s18 + $0x54] ss:$40 sps:$4 sm:$0xff]  }
  0x7c   : > { %v3795_v39 = vld [vmem:[#allocation5 + $0x180] sm:$0xff]   ;;  %v3797_v41 = vld [vmem:[#allocation5 + $0x1c8] sm:$0xff]   ;;  %v4411_v46 = vld [vmem:[%s4378_s18 + $0x50] ss:$40 sps:$4 sm:$0xff]  }
  0x7d   : > { %3295 = vmatpush3.bf16.msra.mxu0 %v3768_v14  ;;  %v3798_v42 = vld [vmem:[#allocation5 + $0x108] sm:$0xff]   ;;  %v4408_v45 = vld [vmem:[%s4378_s18 + $0x5c] ss:$40 sps:$4 sm:$0xff]   ;;  %v4415_v47 = vld [vmem:[%s4378_s18 + $0x58] ss:$40 sps:$4 sm:$0xff]  }
  0x7e   : > { %3335 = vmatpush3.bf16.msra.mxu1 %v3769_v15  ;;  %3296 = vmatprep.subr.bf16.mxu0 %v3770_v16  ;;  %v3799_v43 = vld [vmem:[#allocation5 + $0x188] sm:$0xff]   ;;  %v3806_v48 = vld [vmem:[#allocation5 + $0x150] sm:$0xff]   ;;  %v3810_v52 = vld [vmem:[#allocation5 + $0x158] sm:$0xff]  }
  0x7f   : > { %3336 = vmatprep.subr.bf16.mxu1 %v3771_v17  ;;  %v3807_v49 = vld [vmem:[#allocation5 + $0x1d0] sm:$0xff]   ;;  %v3811_v53 = vld [vmem:[#allocation5 + $0x1d8] sm:$0xff]   ;;  %v4421_v56 = vld [vmem:[%s4378_s18 + $0xa4] ss:$40 sps:$4 sm:$0xff]  }
  0x80   : > { %v3808_v50 = vld [vmem:[#allocation5 + $0x110] sm:$0xff]   ;;  %v3812_v54 = vld [vmem:[#allocation5 + $0x118] sm:$0xff]   ;;  %v4427_v58 = vld [vmem:[%s4378_s18 + $0xa0] ss:$40 sps:$4 sm:$0xff]  }
  0x81   : > { %3297 = vmatpush3.bf16.msra.mxu0 %v3772_v18  ;;  %v3809_v51 = vld [vmem:[#allocation5 + $0x190] sm:$0xff]   ;;  %v3813_v55 = vld [vmem:[#allocation5 + $0x198] sm:$0xff]   ;;  %v3820_v60 = vld [vmem:[#allocation5 + $0x160] sm:$0xff]  }
  0x82   : > { %3337 = vmatpush3.bf16.msra.mxu1 %v3773_v19  ;;  %3298 = vmatprep.subr.bf16.mxu0 %v3774_v20  ;;  %v4424_v57 = vld [vmem:[%s4378_s18 + $0xac] ss:$40 sps:$4 sm:$0xff]   ;;  %v4430_v59 = vld [vmem:[%s4378_s18 + $0xa8] ss:$40 sps:$4 sm:$0xff]   ;;  %v3821_v61 = vld [vmem:[#allocation5 + $0x1e0] sm:$0xff]  }
  0x83   : > { %3338 = vmatprep.subr.bf16.mxu1 %v3775_v21  ;;  %v3822_v62 = vld [vmem:[#allocation5 + $0x120] sm:$0xff]   ;;  %v3824_v0 = vld [vmem:[#allocation5 + $0x168] sm:$0xff]   ;;  %v4437_v4 = vld [vmem:[%s4378_s18 + $0xf4] ss:$40 sps:$4 sm:$0xff]  }
  0x84   : > { %v3823_v63 = vld [vmem:[#allocation5 + $0x1a0] sm:$0xff]   ;;  %v3825_v1 = vld [vmem:[#allocation5 + $0x1e8] sm:$0xff]   ;;  %v4444_v6 = vld [vmem:[%s4378_s18 + $0xf0] ss:$40 sps:$4 sm:$0xff]  }
  0x85   : > { %3299 = vmatpush3.bf16.msra.mxu0 %v3776_v22  ;;  %v3826_v2 = vld [vmem:[#allocation5 + $0x128] sm:$0xff]   ;;  %v4440_v5 = vld [vmem:[%s4378_s18 + $0xfc] ss:$40 sps:$4 sm:$0xff]   ;;  %v4447_v7 = vld [vmem:[%s4378_s18 + $0xf8] ss:$40 sps:$4 sm:$0xff]  }
  0x86   : > { %3339 = vmatpush3.bf16.msra.mxu1 %v3777_v23  ;;  %3300 = vmatprep.subr.bf16.mxu0 %v3778_v24  ;;  %v3827_v3 = vld [vmem:[#allocation5 + $0x1a8] sm:$0xff]   ;;  %v3834_v8 = vld [vmem:[#allocation5 + $0x170] sm:$0xff]   ;;  %v3838_v12 = vld [vmem:[#allocation5 + $0x178] sm:$0xff]  }
  0x87   : > { %3340 = vmatprep.subr.bf16.mxu1 %v3779_v25  ;;  %v3835_v9 = vld [vmem:[#allocation5 + $0x1f0] sm:$0xff]   ;;  %v3839_v13 = vld [vmem:[#allocation5 + $0x1f8] sm:$0xff]   ;;  %v3848_v20 = vld [vmem:[#allocation5 + $0x240] sm:$0xff]  }
  0x88   : > { %v3836_v10 = vld [vmem:[#allocation5 + $0x130] sm:$0xff]   ;;  %v3840_v14 = vld [vmem:[#allocation5 + $0x138] sm:$0xff]   ;;  %v3849_v21 = vld [vmem:[#allocation5 + $0x200] sm:$0xff]  }
  0x89   : > { %3301 = vmatpush3.bf16.msra.mxu0 %v3780_v26  ;;  %v3837_v11 = vld [vmem:[#allocation5 + $0x1b0] sm:$0xff]   ;;  %v3841_v15 = vld [vmem:[#allocation5 + $0x1b8] sm:$0xff]   ;;  %v3850_v22 = vld [vmem:[#allocation5 + $0x248] sm:$0xff]  }
  0x8a   : > { %3341 = vmatpush3.bf16.msra.mxu1 %v3781_v27  ;;  %3302 = vmatprep.subr.bf16.mxu0 %v3782_v28  ;;  %v4453_v16 = vld [vmem:[%s4378_s18 + $0x10] ss:$40 sps:$4 sm:$0xff]   ;;  %v4456_v17 = vld [vmem:[%s4378_s18 + $0x14] ss:$40 sps:$4 sm:$0xff]   ;;  %v3851_v23 = vld [vmem:[#allocation5 + $0x208] sm:$0xff]  }
  0x8b   : > { %3342 = vmatprep.subr.bf16.mxu1 %v3783_v29  ;;  %v4459_v18 = vld [vmem:[%s4378_s18 + $0x18] ss:$40 sps:$4 sm:$0xff]   ;;  %v4463_v19 = vld [vmem:[%s4378_s18 + $0x1c] ss:$40 sps:$4 sm:$0xff]   ;;  %v4472_v25 = vld [vmem:[%s4378_s18 + $0x6c] ss:$40 sps:$4 sm:$0xff]  }
  0x8c   : > { %v4469_v24 = vld [vmem:[%s4378_s18 + $0x64] ss:$40 sps:$4 sm:$0xff]   ;;  %v4475_v26 = vld [vmem:[%s4378_s18 + $0x60] ss:$40 sps:$4 sm:$0xff]   ;;  %v3858_v28 = vld [vmem:[#allocation5 + $0x250] sm:$0xff]  }
  0x8d   : > { %3303 = vmatpush3.bf16.msra.mxu0 %v3784_v30  ;;  %v4478_v27 = vld [vmem:[%s4378_s18 + $0x68] ss:$40 sps:$4 sm:$0xff]   ;;  %v3860_v30 = vld [vmem:[#allocation5 + $0x258] sm:$0xff]  }
  0x8e   : > { %3343 = vmatpush3.bf16.msra.mxu1 %v3785_v31  ;;  %3368 = vmatprep.subr.bf16.mxu0 %v3792_v36  ;;  %v3859_v29 = vld [vmem:[#allocation5 + $0x210] sm:$0xff]   ;;  %v3861_v31 = vld [vmem:[#allocation5 + $0x218] sm:$0xff]  }
  0x8f   : > { %3408 = vmatprep.subr.bf16.mxu1 %v3793_v37  ;;  %v4485_v36 = vld [vmem:[%s4378_s18 + $0xb4] ss:$40 sps:$4 sm:$0xff]  }
  0x90   : > { %1261 = vmatmul.mubr.bf16.vlgmr.msra.gmra.mrb[0].mxu0 %v4389_v32  ;;  %v4488_v37 = vld [vmem:[%s4378_s18 + $0xbc] ss:$40 sps:$4 sm:$0xff]  }
  0x91   : > { %1326 = vmatmul.mubr.bf16.vlgmr.msra.gmra.mrb[0].mxu1 %v4395_v34  ;;  %3369 = vmatpush3.bf16.msra.mxu0 %v3794_v38  ;;  %v4491_v38 = vld [vmem:[%s4378_s18 + $0xb0] ss:$40 sps:$4 sm:$0xff]  }
  0x92   : > { %3409 = vmatpush3.bf16.msra.mxu1 %v3795_v39  ;;  %3370 = vmatprep.subr.bf16.mxu0 %v3796_v40  ;;  %v3868_v39 = vld [vmem:[#allocation5 + $0x260] sm:$0xff]  }
  0x93   : > { %3410 = vmatprep.subr.bf16.mxu1 %v3797_v41  ;;  %1268 = vmatprep.mubr.bf16.mxu0 %v4405_v44  ;;  %v4496_v40 = vld [vmem:[%s4378_s18 + $0xb8] ss:$40 sps:$4 sm:$0xff]  }
  0x94   : > { %1333 = vmatprep.mubr.bf16.mxu1 %v4408_v45  ;;  %v3869_v41 = vld [vmem:[#allocation5 + $0x220] sm:$0xff]  }
  0x95   : > { %3371 = vmatpush3.bf16.msra.mxu0 %v3798_v42  ;;  %v3870_v42 = vld [vmem:[#allocation5 + $0x268] sm:$0xff]  }
  0x96   : > { %3411 = vmatpush3.bf16.msra.mxu1 %v3799_v43  ;;  %3372 = vmatprep.subr.bf16.mxu0 %v3806_v48  ;;  %v3872_v43 = vld [vmem:[%s4378_s18 + $0x104] ss:$40 sps:$4 sm:$0xff]  }
  0x97   : > { %3412 = vmatprep.subr.bf16.mxu1 %v3807_v49  ;;  %v4502_v48 = vld [vmem:[%s4378_s18 + $0x10c] ss:$40 sps:$4 sm:$0xff]  }
  0x98   : > { %1269 = vmatmul.mubr.bf16.gmra.mrb[4].mxu0 %v4411_v46  ;;  %v3871_v49 = vld [vmem:[#allocation5 + $0x228] sm:$0xff]  }
  0x99   : > { %1334 = vmatmul.mubr.bf16.gmra.mrb[4].mxu1 %v4415_v47  ;;  %3373 = vmatpush3.bf16.msra.mxu0 %v3808_v50  ;;  %v3876_v50 = vld [vmem:[%s4378_s18 + $0x100] ss:$40 sps:$4 sm:$0xff]  }
  0x9a   : > { %3413 = vmatpush3.bf16.msra.mxu1 %v3809_v51  ;;  %3374 = vmatprep.subr.bf16.mxu0 %v3810_v52  ;;  %v3878_v51 = vld [vmem:[#allocation5 + $0x270] sm:$0xff]  }
  0x9b   : > { %3414 = vmatprep.subr.bf16.mxu1 %v3811_v53  ;;  %1276 = vmatprep.mubr.bf16.mxu0 %v4421_v56  ;;  %v4507_v52 = vld [vmem:[%s4378_s18 + $0x108] ss:$40 sps:$4 sm:$0xff]  }
  0x9c   : > { %1341 = vmatprep.mubr.bf16.mxu1 %v4424_v57  ;;  %v3879_v53 = vld [vmem:[#allocation5 + $0x230] sm:$0xff]  }
  0x9d   : > { %3375 = vmatpush3.bf16.msra.mxu0 %v3812_v54  ;;  %v3880_v54 = vld [vmem:[#allocation5 + $0x278] sm:$0xff]  }
  0x9e   : > { %3415 = vmatpush3.bf16.msra.mxu1 %v3813_v55  ;;  %3376 = vmatprep.subr.bf16.mxu0 %v3820_v60  ;;  %v3884_v55 = vld [vmem:[%s4378_s18 + $0x24] ss:$40 sps:$4 sm:$0xff]  }
  0x9f   : > { %3416 = vmatprep.subr.bf16.mxu1 %v3821_v61  ;;  %v3887_v60 = vld [vmem:[%s4378_s18 + $0xc4] ss:$40 sps:$4 sm:$0xff]   ;;  %v3881_v61 = vld [vmem:[#allocation5 + $0x238] sm:$0xff]  }
  0xa0   : > { %1277 = vmatmul.mubr.bf16.gmra.mrb[8].mxu0 %v4427_v58 }
  0xa1   : > { %1342 = vmatmul.mubr.bf16.gmra.mrb[8].mxu1 %v4430_v59  ;;  %3377 = vmatpush3.bf16.msra.mxu0 %v3822_v62  ;;  %v3882_v62 = vld [vmem:[%s4378_s18 + $0x20] ss:$40 sps:$4 sm:$0xff]  }
  0xa2   : > { %3417 = vmatpush3.bf16.msra.mxu1 %v3823_v63  ;;  %3378 = vmatprep.subr.bf16.mxu0 %v3824_v0  ;;  %v3885_v63 = vld [vmem:[%s4378_s18 + $0xc0] ss:$40 sps:$4 sm:$0xff]   ;;  %v3888_v0 = vld [vmem:[%s4378_s18 + $0x74] ss:$40 sps:$4 sm:$0xff]  }
  0xa3   : > { %3418 = vmatprep.subr.bf16.mxu1 %v3825_v1  ;;  %1284 = vmatprep.mubr.bf16.mxu0 %v4437_v4  ;;  %v3890_v1 = vld [vmem:[%s4378_s18 + $0x114] ss:$40 sps:$4 sm:$0xff]  }
  0xa4   : > { %1349 = vmatprep.mubr.bf16.mxu1 %v4440_v5 }
  0xa5   : > { %3379 = vmatpush3.bf16.msra.mxu0 %v3826_v2  ;;  %v3892_v2 = vld [vmem:[%s4378_s18 + $0x70] ss:$40 sps:$4 sm:$0xff]  }
  0xa6   : > { %3419 = vmatpush3.bf16.msra.mxu1 %v3827_v3  ;;  %3380 = vmatprep.subr.bf16.mxu0 %v3834_v8  ;;  %v3893_v3 = vld [vmem:[%s4378_s18 + $0x110] ss:$40 sps:$4 sm:$0xff]   ;;  %v3908_v8 = vld [vmem:[#allocation7 + $0x28] sm:$0xff]  }
  0xa7   : > { %3420 = vmatprep.subr.bf16.mxu1 %v3835_v9  ;;  %v3909_v9 = vld [vmem:[#allocation7 + $0x88] sm:$0xff]  }
  0xa8   : > { %1285 = vmatmul.mubr.bf16.gmra.mrb[12].mxu0 %v4444_v6 }
  0xa9   : > { %1350 = vmatmul.mubr.bf16.gmra.mrb[12].mxu1 %v4447_v7  ;;  %3381 = vmatpush3.bf16.msra.mxu0 %v3836_v10  ;;  %v3910_v10 = vld [vmem:[#allocation7 + $0x70] sm:$0xff]  }
  0xaa   : > { %3421 = vmatpush3.bf16.msra.mxu1 %v3837_v11  ;;  %3382 = vmatprep.subr.bf16.mxu0 %v3838_v12  ;;  %v3911_v11 = vld [vmem:[#allocation7 + $0xd0] sm:$0xff]  }
  0xab   : > { %3422 = vmatprep.subr.bf16.mxu1 %v3839_v13  ;;  %1390 = vmatprep.mubr.bf16.mxu0 %v4456_v17  ;;  %v3912_v12 = vld [vmem:[#allocation7 + $0x30] sm:$0xff]  }
  0xac   : > { %1455 = vmatprep.mubr.bf16.mxu1 %v4463_v19  ;;  %v3913_v13 = vld [vmem:[#allocation7 + $0x90] sm:$0xff]  }
  0xad   : > { %3383 = vmatpush3.bf16.msra.mxu0 %v3840_v14  ;;  %v3914_v14 = vld [vmem:[#allocation7 + $0x78] sm:$0xff]  }
  0xae   : > { %3423 = vmatpush3.bf16.msra.mxu1 %v3841_v15  ;;  %3448 = vmatprep.subr.bf16.mxu0 %v3848_v20  ;;  %v3915_v15 = vld [vmem:[#allocation7 + $0xd8] sm:$0xff]  }
  0xaf   : > { %3652 = vmatprep.subr.bf16.mxu1 %v3848_v20  ;;  %v3920_v20 = vld [vmem:[#allocation7 + $0xa0] sm:$0xff]  }
  0xb0   : > { %1391 = vmatmul.mubr.bf16.vlgmr.msra.gmra.mrb[16].mxu0 %v4453_v16 }
  0xb1   : > { %1456 = vmatmul.mubr.bf16.vlgmr.msra.gmra.mrb[16].mxu1 %v4459_v18  ;;  %3449 = vmatpush3.bf16.msra.mxu0 %v3849_v21 }
  0xb2   : > { %3660 = vmatpush3.bf16.msra.mxu1 %v3849_v21  ;;  %3450 = vmatprep.subr.bf16.mxu0 %v3850_v22  ;;  %v3922_v21 = vld [vmem:[#allocation7 + $0xe8] sm:$0xff]  }
  0xb3   : > { %3653 = vmatprep.subr.bf16.mxu1 %v3850_v22  ;;  %1398 = vmatprep.mubr.bf16.mxu0 %v4469_v24  ;;  %v3924_v22 = vld [vmem:[#allocation7 + $0xa8] sm:$0xff]  }
  0xb4   : > { %1463 = vmatprep.mubr.bf16.mxu1 %v4472_v25 }
  0xb5   : > { %3451 = vmatpush3.bf16.msra.mxu0 %v3851_v23 }
  0xb6   : > { %3661 = vmatpush3.bf16.msra.mxu1 %v3851_v23  ;;  %3452 = vmatprep.subr.bf16.mxu0 %v3858_v28  ;;  %v3926_v23 = vld [vmem:[#allocation7 + $0xf0] sm:$0xff]  }
  0xb7   : > { %3654 = vmatprep.subr.bf16.mxu1 %v3858_v28 }
  0xb8   : > { %1399 = vmatmul.mubr.bf16.gmra.mrb[20].mxu0 %v4475_v26 }
  0xb9   : > { %1464 = vmatmul.mubr.bf16.gmra.mrb[20].mxu1 %v4478_v27  ;;  %3453 = vmatpush3.bf16.msra.mxu0 %v3859_v29 }
  0xba   : > { %3662 = vmatpush3.bf16.msra.mxu1 %v3859_v29  ;;  %3454 = vmatprep.subr.bf16.mxu0 %v3860_v30 }
  0xbb   : > { %3655 = vmatprep.subr.bf16.mxu1 %v3860_v30  ;;  %1406 = vmatprep.mubr.bf16.mxu0 %v4485_v36 }
  0xbc   : > { %1471 = vmatprep.mubr.bf16.mxu1 %v4488_v37 }
  0xbd   : > { %3455 = vmatpush3.bf16.msra.mxu0 %v3861_v31 }
  0xbe   : > { %3663 = vmatpush3.bf16.msra.mxu1 %v3861_v31  ;;  %3456 = vmatprep.subr.bf16.mxu0 %v3868_v39 }
  0xbf   : > { %3656 = vmatprep.subr.bf16.mxu1 %v3868_v39 }
  0xc0   : > { %1407 = vmatmul.mubr.bf16.gmra.mrb[24].mxu0 %v4491_v38 }
  0xc1   : > { %1472 = vmatmul.mubr.bf16.gmra.mrb[24].mxu1 %v4496_v40  ;;  %3457 = vmatpush3.bf16.msra.mxu0 %v3869_v41 }
  0xc2   : > { %1414 = vmatprep.mubr.bf16.mxu0 %v3872_v43  ;;  %3664 = vmatpush3.bf16.msra.mxu1 %v3869_v41 }
  0xc3   : > { %3458 = vmatprep.subr.bf16.mxu0 %v3870_v42  ;;  %3657 = vmatprep.subr.bf16.mxu1 %v3870_v42 }
  0xc4   : > { %1479 = vmatprep.mubr.bf16.mxu1 %v4502_v48 }
  0xc5   : > { %3459 = vmatpush3.bf16.msra.mxu0 %v3871_v49 }
  0xc6   : > { %3665 = vmatpush3.bf16.msra.mxu1 %v3871_v49  ;;  %3460 = vmatprep.subr.bf16.mxu0 %v3878_v51 }
  0xc7   : > { %3658 = vmatprep.subr.bf16.mxu1 %v3878_v51 }
  0xc8   : > { %1415 = vmatmul.mubr.bf16.gmra.mrb[28].mxu0 %v3876_v50 }
  0xc9   : > { %1480 = vmatmul.mubr.bf16.gmra.mrb[28].mxu1 %v4507_v52  ;;  %1520 = vmatprep.mubr.bf16.mxu0 %v3884_v55 }
  0xca   : > { %3461 = vmatpush3.bf16.msra.mxu0 %v3879_v53  ;;  %1536 = vmatprep.mubr.bf16.mxu1 %v3887_v60 }
  0xcb   : > { %3666 = vmatpush3.bf16.msra.mxu1 %v3879_v53  ;;  %3462 = vmatprep.subr.bf16.mxu0 %v3880_v54 }
  0xcc   : > { %3659 = vmatprep.subr.bf16.mxu1 %v3880_v54 }
  0xce   : > { %3463 = vmatpush3.bf16.msra.mxu0 %v3881_v61 }
  0xcf   : > { %3667 = vmatpush3.bf16.msra.mxu1 %v3881_v61  ;;  %1647 = vmatprep.subr.bf16.mxu0 %v4456_v17  ;;  %v3917_v17 = vld [vmem:[#allocation7 + $0x98] sm:$0xff]  }
  0xd0   : > { %1565 = vmatprep.subr.bf16.mxu1 %v4392_v33  ;;  %v4158_v33 = vmov 1065369472  }
  0xd1   : > { %1521 = vmatmul.mubr.bf16.vlgmr.msra.gmra.mrb[32].mxu0 %v3882_v62 }
  0xd2   : > { %1537 = vmatmul.mubr.bf16.vlgmr.msra.gmra.mrb[32].mxu1 %v3885_v63  ;;  %1528 = vmatprep.mubr.bf16.mxu0 %v3888_v0 }
  0xd3   : > { %1566 = vmatpush1.bf16.msra.mxu1 %v4389_v32  ;;  %1544 = vmatprep.mubr.bf16.mxu1 %v3890_v1  ;;  %v4157_v32 = vmov 0  }
  0xd4   : > { %1567 = vmatprep.subr.bf16.mxu1 %v4405_v44  ;;  %1648 = vmatpush1.bf16.msra.mxu0 %v4453_v16  ;;  %v3896_v44 = vld [vmem:[#allocation7 + $0x48] sm:$0xff]   ;;  %v3916_v16 = vld [vmem:[#allocation7 + $0x38] sm:$0xff]  }
  0xd5   : > { %1649 = vmatprep.subr.bf16.mxu0 %v4469_v24  ;;  %v3928_v24 = vld [vmem:[#allocation7 + $0xb0] sm:$0xff]  }
  0xd7   : > { %1568 = vmatpush1.bf16.msra.mxu1 %v4411_v46  ;;  %v3898_v46 = vld [vmem:[#allocation7 + $0x50] sm:$0xff]  }
  0xd8   : > { %1569 = vmatprep.subr.bf16.mxu1 %v4421_v56  ;;  %1650 = vmatpush1.bf16.msra.mxu0 %v4475_v26  ;;  %v3900_v56 = vld [vmem:[#allocation7 + $0x58] sm:$0xff]  }
  0xd9   : > { %1529 = vmatmul.mubr.bf16.gmra.mrb[36].mxu0 %v3892_v2  ;;  %1651 = vmatprep.subr.bf16.mxu0 %v4485_v36  ;;  %v3932_v26 = vld [vmem:[#allocation7 + $0xb8] sm:$0xff]  }
  0xda   : > { %1545 = vmatmul.mubr.bf16.gmra.mrb[36].mxu1 %v3893_v3  ;;  %1679 = vmatprep.mubr.bf16.mxu0 %v4157_v32 }
  0xdb   : > { %1570 = vmatpush1.bf16.msra.mxu1 %v4427_v58  ;;  %1597 = vmatprep.mubr.bf16.mxu1 %v4157_v32  ;;  %v3902_v58 = vld [vmem:[#allocation7 + $0x60] sm:$0xff]  }
  0xdc   : > { %1571 = vmatprep.subr.bf16.mxu1 %v4437_v4  ;;  %1652 = vmatpush1.bf16.msra.mxu0 %v4491_v38  ;;  %v3904_v4 = vld [vmem:[#allocation7 + $0x20] sm:$0xff]  }
  0xdd   : > { %1653 = vmatprep.subr.bf16.mxu0 %v3872_v43 }
  0xdf   : > { %1572 = vmatpush1.bf16.msra.mxu1 %v4444_v6  ;;  %v3906_v6 = vld [vmem:[#allocation7 + $0x68] sm:$0xff]  }
  0xe0   : > { %1606 = vmatprep.subr.bf16.mxu1 %v4398_v35  ;;  %1654 = vmatpush1.bf16.msra.mxu0 %v3876_v50  ;;  %v3895_v35 = vld [vmem:[#allocation7] sm:$0xff]  }
  0xe1   : > { %1729 = vmatprep.subr.bf16.mxu0 %v3884_v55 }
  0xe2   : > { %3176 = vmatmul.mubr.msk.bf16.vlgmr.msra.gmra.mrb[40].mxu1 %vm1561_vm0, %v4158_v33 }
  0xe3   : > { %1607 = vmatpush1.bf16.msra.mxu1 %v4395_v34  ;;  %1638 = vmatprep.mubr.bf16.mxu1 %v4157_v32  ;;  %v3894_v34 = vld [vmem:[#allocation7 + $0x40] sm:$0xff]  }
  0xe4   : > { %1608 = vmatprep.subr.bf16.mxu1 %v4408_v45  ;;  %3178 = vmatmul.mubr.msk.bf16.vlgmr.msra.gmra.mrb[40].mxu0 %vm1561_vm0, %v4158_v33  ;;  %v3897_v45 = vld [vmem:[#allocation7 + $0x8] sm:$0xff]  }
  0xe5   : > { %1730 = vmatpush1.bf16.msra.mxu0 %v3882_v62  ;;  %1761 = vmatprep.mubr.bf16.mxu0 %v4157_v32 }
  0xe6   : > { %1731 = vmatprep.subr.bf16.mxu0 %v3888_v0 }
  0xe7   : > { %1609 = vmatpush1.bf16.msra.mxu1 %v4415_v47  ;;  %v3899_v47 = vld [vmem:[#allocation7 + $0x10] sm:$0xff]  }
  0xe8   : > { %1610 = vmatprep.subr.bf16.mxu1 %v4424_v57  ;;  %v3901_v57 = vld [vmem:[#allocation7 + $0x18] sm:$0xff]  }
  0xe9   : > { %1732 = vmatpush1.bf16.msra.mxu0 %v3892_v2 }
  0xea   : > { %1733 = vmatprep.subr.bf16.mxu0 %v3887_v60 }
  0xeb   : > { %1611 = vmatpush1.bf16.msra.mxu1 %v4430_v59  ;;  %v3903_v59 = vld [vmem:[#allocation7 + $0xc0] sm:$0xff]  }
  0xec   : > { %1612 = vmatprep.subr.bf16.mxu1 %v4440_v5  ;;  %v3905_v5 = vld [vmem:[#allocation7 + $0x80] sm:$0xff]  }
  0xed   : > { %1734 = vmatpush1.bf16.msra.mxu0 %v3885_v63 }
  0xee   : > { %1735 = vmatprep.subr.bf16.mxu0 %v3890_v1 }
  0xef   : > { %1613 = vmatpush1.bf16.msra.mxu1 %v4447_v7  ;;  %v3907_v7 = vld [vmem:[#allocation7 + $0xc8] sm:$0xff]  }
  0xf0   : > { %1688 = vmatprep.subr.bf16.mxu1 %v4463_v19  ;;  %v3919_v19 = vld [vmem:[#allocation7 + $0x140] sm:$0xff]  }
  0xf1   : > { %1736 = vmatpush1.bf16.msra.mxu0 %v3893_v3 }
  0xf2   : > { %3177 = vmatmul.mubr.msk.bf16.vlgmr.msra.gmra.mrb[44].mxu1 %vm1561_vm0, %v4158_v33  ;;  %3510 = vmatprep.subr.bf16.mxu0 %v3903_v59 }
  0xf3   : > { %1689 = vmatpush1.bf16.msra.mxu1 %v4459_v18  ;;  %1720 = vmatprep.mubr.bf16.mxu1 %v4157_v32  ;;  %v3918_v18 = vld [vmem:[#allocation7 + $0xe0] sm:$0xff]  }
  0xf4   : > { %1690 = vmatprep.subr.bf16.mxu1 %v4472_v25  ;;  %3180 = vmatmul.mubr.msk.bf16.vlgmr.msra.gmra.mrb[44].mxu0 %vm1561_vm0, %v4158_v33  ;;  %v3930_v25 = vld [vmem:[#allocation7 + $0xf8] sm:$0xff]  }
  0xf5   : > { %3511 = vmatpush3.bf16.msra.mxu0 %v3905_v5 }
  0xf6   : > { %3512 = vmatprep.subr.bf16.mxu0 %v3907_v7 }
  0xf7   : > { %1691 = vmatpush1.bf16.msra.mxu1 %v4478_v27  ;;  %v3935_v27 = vld [vmem:[#allocation7 + $0x1c0] sm:$0xff]  }
  0xf8   : > { %1692 = vmatprep.subr.bf16.mxu1 %v4488_v37 }
  0xf9   : > { %3513 = vmatpush3.bf16.msra.mxu0 %v3909_v9 }
  0xfa   : > { %3514 = vmatprep.subr.bf16.mxu0 %v3911_v11 }
  0xfb   : > { %1693 = vmatpush1.bf16.msra.mxu1 %v4496_v40 }
  0xfc   : > { %1694 = vmatprep.subr.bf16.mxu1 %v4502_v48 }
  0xfd   : > { %3515 = vmatpush3.bf16.msra.mxu0 %v3913_v13 }
  0xfe   : > { %3516 = vmatprep.subr.bf16.mxu0 %v3915_v15 }
  0xff   : > { %1695 = vmatpush1.bf16.msra.mxu1 %v4507_v52 }
 0x100   : > { %3488 = vmatprep.subr.bf16.mxu1 %v3894_v34 }
 0x101   : > { %3517 = vmatpush3.bf16.msra.mxu0 %v3917_v17 }
 0x102   : > { %3179 = vmatmul.mubr.msk.bf16.vlgmr.msra.gmra.mrb[48].mxu1 %vm1561_vm0, %v4158_v33  ;;  %3518 = vmatprep.subr.bf16.mxu0 %v3918_v18 }
 0x103   : > { %3489 = vmatpush3.bf16.msra.mxu1 %v3895_v35 }
 0x104   : > { %3490 = vmatprep.subr.bf16.mxu1 %v3896_v44 }
 0x105   : > { %3519 = vmatpush3.bf16.msra.mxu0 %v3920_v20 }
 0x106   : > { %3520 = vmatprep.subr.bf16.mxu0 %v3922_v21 }
 0x107   : > { %3491 = vmatpush3.bf16.msra.mxu1 %v3897_v45 }
 0x108   : > { %3492 = vmatprep.subr.bf16.mxu1 %v3898_v46 }
 0x109   : > { %3521 = vmatpush3.bf16.msra.mxu0 %v3924_v22 }
 0x10a   : > { %3522 = vmatprep.subr.bf16.mxu0 %v3926_v23 }
 0x10b   : > { %3493 = vmatpush3.bf16.msra.mxu1 %v3899_v47 }
 0x10c   : > { %3494 = vmatprep.subr.bf16.mxu1 %v3900_v56 }
 0x10d   : > { %3523 = vmatpush3.bf16.msra.mxu0 %v3928_v24 }
 0x10e   : > { %3524 = vmatprep.subr.bf16.mxu0 %v3930_v25 }
 0x10f   : > { %3495 = vmatpush3.bf16.msra.mxu1 %v3901_v57 }
 0x110   : > { %3496 = vmatprep.subr.bf16.mxu1 %v3902_v58 }
 0x111   : > { %3525 = vmatpush3.bf16.msra.mxu0 %v3932_v26 }
 0x112   : > { %3554 = vmatprep.subr.bf16.mxu0 %v3935_v27 }
 0x113   : > { %3497 = vmatpush3.bf16.msra.mxu1 %v3904_v4 }
 0x114   : > { %3498 = vmatprep.subr.bf16.mxu1 %v3906_v6 }
 0x117   : > { %3499 = vmatpush3.bf16.msra.mxu1 %v3908_v8 }
 0x118   : > { %3500 = vmatprep.subr.bf16.mxu1 %v3910_v10 }
 0x11b   : > { %3501 = vmatpush3.bf16.msra.mxu1 %v3912_v12 }
 0x11c   : > { %3502 = vmatprep.subr.bf16.mxu1 %v3914_v14 }
 0x11f   : > { %3503 = vmatpush3.bf16.msra.mxu1 %v3916_v16 }
 0x120   : > { %3532 = vmatprep.subr.bf16.mxu1 %v3919_v19 }
 0x163   : > { %v3304_v28 = vpop.f32.mrb[0].mxu0 }
 0x164   : > { %v3344_v29 = vpop.f32.mrb[0].mxu1  ;;  %v3305_v30 = vpop.f32.mrb[1].mxu0 }
 0x165   : > { %v3306_v31 = vadd.f32 %v3305_v30, %v3304_v28  ;;  %v3345_v36 = vpop.f32.mrb[1].mxu1  ;;  %v3307_v37 = vpop.f32.mrb[2].mxu0 }
 0x166   : > { %v3346_v38 = vadd.f32 %v3345_v36, %v3344_v29  ;;  %v3347_v39 = vpop.f32.mrb[2].mxu1  ;;  %v3308_v40 = vpop.f32.mrb[3].mxu0 }
 0x167   : > { %v3309_v41 = vadd.f32 %v3308_v40, %v3307_v37  ;;  %v3348_v42 = vpop.f32.mrb[3].mxu1 }
 0x168   : > { %v1328_v43 = vadd.f32 %v3346_v38, %v3306_v31  ;;  %v3349_v48 = vadd.f32 %v3348_v42, %v3347_v39 }
 0x16a   : > { %v1331_v49 = vadd.f32 %v3349_v48, %v3309_v41 }
 0x16b   : > { %v3310_v50 = vpop.f32.mrb[4].mxu0 }
 0x16c   : > { %v3350_v51 = vpop.f32.mrb[4].mxu1  ;;  %v3311_v52 = vpop.f32.mrb[5].mxu0 }
 0x16d   : > { %v3312_v53 = vadd.f32 %v3311_v52, %v3310_v50  ;;  %v3351_v54 = vpop.f32.mrb[5].mxu1  ;;  %v3313_v55 = vpop.f32.mrb[6].mxu0 }
 0x16e   : > { %v3352_v60 = vadd.f32 %v3351_v54, %v3350_v51  ;;  %v3353_v61 = vpop.f32.mrb[6].mxu1  ;;  %v3314_v62 = vpop.f32.mrb[7].mxu0 }
 0x16f   : > { %v3315_v63 = vadd.f32 %v3314_v62, %v3313_v55  ;;  %v3354_v0 = vpop.f32.mrb[7].mxu1 }
 0x170   : > { %v1336_v1 = vadd.f32 %v3352_v60, %v3312_v53  ;;  %v3355_v2 = vadd.f32 %v3354_v0, %v3353_v61 }
 0x172   : > { %v1339_v3 = vadd.f32 %v3355_v2, %v3315_v63 }
 0x173   : > { %v3316_v32 = vpop.f32.mrb[8].mxu0 }
 0x174   : > { %v3356_v33 = vpop.f32.mrb[8].mxu1  ;;  %v3317_v34 = vpop.f32.mrb[9].mxu0 }
 0x175   : > { %v3318_v35 = vadd.f32 %v3317_v34, %v3316_v32  ;;  %v3357_v44 = vpop.f32.mrb[9].mxu1  ;;  %v3319_v45 = vpop.f32.mrb[10].mxu0 }
 0x176   : > { %v3358_v46 = vadd.f32 %v3357_v44, %v3356_v33  ;;  %v3359_v47 = vpop.f32.mrb[10].mxu1  ;;  %v3320_v56 = vpop.f32.mrb[11].mxu0 }
 0x177   : > { %v3321_v57 = vadd.f32 %v3320_v56, %v3319_v45  ;;  %v3360_v58 = vpop.f32.mrb[11].mxu1 }
 0x178   : > { %v1344_v59 = vadd.f32 %v3358_v46, %v3318_v35  ;;  %v3361_v4 = vadd.f32 %v3360_v58, %v3359_v47 }
 0x17a   : > { %v1347_v5 = vadd.f32 %v3361_v4, %v3321_v57 }
 0x17b   : > { %v3322_v6 = vpop.f32.mrb[12].mxu0 }
 0x17c   : > { %v3362_v7 = vpop.f32.mrb[12].mxu1  ;;  %v3323_v8 = vpop.f32.mrb[13].mxu0 }
 0x17d   : > { %v3363_v9 = vpop.f32.mrb[13].mxu1  ;;  %v3324_v10 = vadd.f32 %v3323_v8, %v3322_v6  ;;  %v3325_v12 = vpop.f32.mrb[14].mxu0 }
 0x17e   : > { %v3364_v11 = vadd.f32 %v3363_v9, %v3362_v7  ;;  %v3365_v13 = vpop.f32.mrb[14].mxu1  ;;  %v3326_v14 = vpop.f32.mrb[15].mxu0 }
 0x17f   : > { %v3366_v15 = vpop.f32.mrb[15].mxu1  ;;  %v3327_v17 = vadd.f32 %v3326_v14, %v3325_v12 }
 0x180   : > { %v1352_v16 = vadd.f32 %v3364_v11, %v3324_v10  ;;  %v3367_v18 = vadd.f32 %v3366_v15, %v3365_v13 }
 0x182   : > { %v1355_v19 = vadd.f32 %v3367_v18, %v3327_v17 }
 0x183   : > { %v3384_v20 = vpop.f32.mrb[16].mxu0 }
 0x184   : > { %v3385_v21 = vpop.f32.mrb[17].mxu0  ;;  %v3424_v22 = vpop.f32.mrb[16].mxu1 }
 0x185   : > { %v3386_v23 = vadd.f32 %v3385_v21, %v3384_v20  ;;  %v3387_v24 = vpop.f32.mrb[18].mxu0  ;;  %v3425_v25 = vpop.f32.mrb[17].mxu1 }
 0x186   : > { %v3388_v26 = vpop.f32.mrb[19].mxu0  ;;  %v3426_v28 = vadd.f32 %v3425_v25, %v3424_v22  ;;  %v3427_v29 = vpop.f32.mrb[18].mxu1 }
 0x187   : > { %v1393_v27 = vadd.f32 %v3386_v23, %v1328_v43  ;;  %v3389_v30 = vadd.f32 %v3388_v26, %v3387_v24  ;;  %v3428_v31 = vpop.f32.mrb[19].mxu1 }
 0x188   : > { %v3429_v38 = vadd.f32 %v3428_v31, %v3427_v29 }
 0x189   : > { %v1458_v36 = vadd.f32 %v3426_v28, %v1393_v27  ;;  %v1396_v37 = vadd.f32 %v3389_v30, %v1331_v49 }
 0x18b   : > { %v4553_v39 = vadd.f32 %v3429_v38, %v1396_v37  ;;  %v3390_v40 = vpop.f32.mrb[20].mxu0 }
 0x18c   : > { %v3391_v41 = vpop.f32.mrb[21].mxu0  ;;  %v3430_v42 = vpop.f32.mrb[20].mxu1 }
 0x18d   : > { %v3392_v48 = vadd.f32 %v3391_v41, %v3390_v40  ;;  %v3393_v50 = vpop.f32.mrb[22].mxu0  ;;  %v3431_v51 = vpop.f32.mrb[21].mxu1 }
 0x18e   : > { %v3394_v52 = vpop.f32.mrb[23].mxu0  ;;  %v3432_v54 = vadd.f32 %v3431_v51, %v3430_v42  ;;  %v3433_v55 = vpop.f32.mrb[22].mxu1 }
 0x18f   : > { %v1401_v53 = vadd.f32 %v3392_v48, %v1336_v1  ;;  %v3395_v43 = vadd.f32 %v3394_v52, %v3393_v50  ;;  %v3434_v60 = vpop.f32.mrb[23].mxu1 }
 0x190   : > { %v3435_v63 = vadd.f32 %v3434_v60, %v3433_v55 }
 0x191   : > { %v1466_v61 = vadd.f32 %v3432_v54, %v1401_v53  ;;  %v1404_v62 = vadd.f32 %v3395_v43, %v1339_v3 }
 0x193   : > { %v4555_v0 = vadd.f32 %v3435_v63, %v1404_v62  ;;  %v3396_v49 = vpop.f32.mrb[24].mxu0 }
 0x194   : > { %v3397_v2 = vpop.f32.mrb[25].mxu0  ;;  %v3436_v32 = vpop.f32.mrb[24].mxu1 }
 0x195   : > { %v3398_v33 = vadd.f32 %v3397_v2, %v3396_v49  ;;  %v3399_v34 = vpop.f32.mrb[26].mxu0  ;;  %v3437_v35 = vpop.f32.mrb[25].mxu1 }
 0x196   : > { %v3400_v44 = vpop.f32.mrb[27].mxu0  ;;  %v3438_v46 = vadd.f32 %v3437_v35, %v3436_v32  ;;  %v3439_v47 = vpop.f32.mrb[26].mxu1 }
 0x197   : > { %v1409_v45 = vadd.f32 %v3398_v33, %v1344_v59  ;;  %v3401_v1 = vadd.f32 %v3400_v44, %v3399_v34  ;;  %v3440_v56 = vpop.f32.mrb[27].mxu1 }
 0x198   : > { %v3441_v4 = vadd.f32 %v3440_v56, %v3439_v47 }
 0x199   : > { %v1474_v57 = vadd.f32 %v3438_v46, %v1409_v45  ;;  %v1412_v58 = vadd.f32 %v3401_v1, %v1347_v5  ;;  %v3921_v1 = vld [vmem:[#allocation7 + $0x100] sm:$0xff]  }
 0x19b   : > { %v1477_v6 = vadd.f32 %v3441_v4, %v1412_v58  ;;  %v3402_v3 = vpop.f32.mrb[28].mxu0  ;;  %v3923_v4 = vld [vmem:[#allocation7 + $0x148] sm:$0xff]  }
 0x19c   : > { %v3403_v7 = vpop.f32.mrb[29].mxu0  ;;  %v3442_v8 = vpop.f32.mrb[28].mxu1 }
 0x19d   : > { %v3404_v9 = vadd.f32 %v3403_v7, %v3402_v3  ;;  %v3405_v10 = vpop.f32.mrb[30].mxu0  ;;  %v3443_v11 = vpop.f32.mrb[29].mxu1  ;;  %v3925_v3 = vld [vmem:[#allocation7 + $0x108] sm:$0xff]   ;;  %v3927_v7 = vld [vmem:[#allocation7 + $0x150] sm:$0xff]  }
 0x19e   : > { %v3406_v12 = vpop.f32.mrb[31].mxu0  ;;  %v3444_v14 = vadd.f32 %v3443_v11, %v3442_v8  ;;  %v3445_v15 = vpop.f32.mrb[30].mxu1  ;;  %v3929_v8 = vld [vmem:[#allocation7 + $0x110] sm:$0xff]   ;;  %v3933_v11 = vld [vmem:[#allocation7 + $0x118] sm:$0xff]  }
 0x19f   : > { %v1417_v13 = vadd.f32 %v3404_v9, %v1352_v16  ;;  %v3407_v17 = vadd.f32 %v3406_v12, %v3405_v10  ;;  %v3446_v59 = vpop.f32.mrb[31].mxu1  ;;  %v3931_v9 = vld [vmem:[#allocation7 + $0x158] sm:$0xff]  }
 0x1a0   : > { %v3447_v21 = vadd.f32 %v3446_v59, %v3445_v15 }
 0x1a1   : > { %v1482_v18 = vadd.f32 %v3444_v14, %v1417_v13  ;;  %v1420_v20 = vadd.f32 %v3407_v17, %v1355_v19  ;;  %v3934_v14 = vld [vmem:[#allocation7 + $0x160] sm:$0xff]  }
 0x1a3   : > { %v1485_v22 = vadd.f32 %v3447_v21, %v1420_v20 }
 0x1a4   : > { %v3464_v23 = vpop.f32.mrb[32].mxu0 }
 0x1a5   : > { %v3476_v5 = vpop.f32.mrb[32].mxu1  ;;  %v3465_v24 = vpop.f32.mrb[33].mxu0 }
 0x1a6   : > { %v3466_v25 = vadd.f32 %v3465_v24, %v3464_v23  ;;  %v3477_v26 = vpop.f32.mrb[33].mxu1  ;;  %v3467_v27 = vpop.f32.mrb[34].mxu0  ;;  %v3936_v23 = vld [vmem:[#allocation7 + $0x120] sm:$0xff]  }
 0x1a7   : > { %v3478_v28 = vadd.f32 %v3477_v26, %v3476_v5  ;;  %v3479_v29 = vpop.f32.mrb[34].mxu1  ;;  %v3468_v30 = vpop.f32.mrb[35].mxu0  ;;  %v3937_v5 = vld [vmem:[#allocation7 + $0x180] sm:$0xff]   ;;  %v3939_v26 = vld [vmem:[#allocation7 + $0x1c8] sm:$0xff]  }
 0x1a8   : > { %v4557_v31 = vadd.f32 %v3466_v25, %v1458_v36  ;;  %v3469_v16 = vadd.f32 %v3468_v30, %v3467_v27  ;;  %v3480_v37 = vpop.f32.mrb[35].mxu1  ;;  %v3938_v25 = vld [vmem:[#allocation7 + $0x168] sm:$0xff]   ;;  %v3942_v30 = vld [vmem:[#allocation7 + $0x170] sm:$0xff]  }
 0x1a9   : > { %v4559_v38 = vadd.f32 %v3478_v28, %v1474_v57  ;;  %v3481_v40 = vadd.f32 %v3480_v37, %v3479_v29  ;;  %v3940_v28 = vld [vmem:[#allocation7 + $0x128] sm:$0xff]   ;;  %v3944_v37 = vld [vmem:[#allocation7 + $0x130] sm:$0xff]  }
 0x1aa   : > { %v4562_v19 = vadd.f32 %v3469_v16, %v4553_v39  ;;  %v3941_v29 = vld [vmem:[#allocation7 + $0x188] sm:$0xff]   ;;  %v3943_v16 = vld [vmem:[#allocation7 + $0x1d0] sm:$0xff]  }
 0x1ab   : > { %v4564_v41 = vadd.f32 %v3481_v40, %v1477_v6  ;;  %v3945_v40 = vld [vmem:[#allocation7 + $0x190] sm:$0xff]  }
 0x1ac   : > { %v3470_v42 = vpop.f32.mrb[36].mxu0 }
 0x1ad   : > { %v3482_v48 = vpop.f32.mrb[36].mxu1  ;;  %v3471_v50 = vpop.f32.mrb[37].mxu0 }
 0x1ae   : > { %v3472_v51 = vadd.f32 %v3471_v50, %v3470_v42  ;;  %v3483_v52 = vpop.f32.mrb[37].mxu1  ;;  %v3473_v53 = vpop.f32.mrb[38].mxu0  ;;  %v3946_v42 = vld [vmem:[#allocation7 + $0x178] sm:$0xff]  }
 0x1af   : > { %v3484_v54 = vadd.f32 %v3483_v52, %v3482_v48  ;;  %v3485_v55 = vpop.f32.mrb[38].mxu1  ;;  %v3474_v36 = vpop.f32.mrb[39].mxu0  ;;  %v3947_v48 = vld [vmem:[#allocation7 + $0x1d8] sm:$0xff]  }
 0x1b0   : > { %v4566_v43 = vadd.f32 %v3472_v51, %v1466_v61  ;;  %v3475_v60 = vadd.f32 %v3474_v36, %v3473_v53  ;;  %v3486_v62 = vpop.f32.mrb[39].mxu1  ;;  %v3948_v51 = vld [vmem:[#allocation7 + $0x138] sm:$0xff]  }
 0x1b1   : > { %v4568_v63 = vadd.f32 %v3484_v54, %v1482_v18  ;;  %v3487_v49 = vadd.f32 %v3486_v62, %v3485_v55  ;;  %v3949_v52 = vld [vmem:[#allocation7 + $0x198] sm:$0xff]   ;;  %v3950_v54 = vld [vmem:[#allocation7 + $0x1e0] sm:$0xff]  }
 0x1b2   : > { %v4571_v39 = vadd.f32 %v3475_v60, %v4555_v0  ;;  %v3951_v55 = vld [vmem:[#allocation7 + $0x240] sm:$0xff]  }
 0x1b3   : > { %v4573_v2 = vadd.f32 %v3487_v49, %v1485_v22 }
 0x1b5   : > { %v1599_v32 = vpop.f32.mrb[40].mxu1 }
 0x1b6   : > { %v1770_v33 = vmul.f32 0.015625, %v1599_v32  ;;  %v1601_v34 = vpop.f32.mrb[41].mxu1 }
 0x1b7   : > { %v1771_v35 = vmul.f32 0.015625, %v1601_v34  ;;  %v1603_v44 = vpop.f32.mrb[42].mxu1  ;;  %v1681_v45 = vpop.f32.mrb[40].mxu0  ;;  %v3952_v34 = vld [vmem:[#allocation7 + $0x1a0] sm:$0xff]  }
 0x1b8   : > { %v1604_v46 = vpop.f32.mrb[43].mxu1  ;;  %v1683_v47 = vpop.f32.mrb[41].mxu0  ;;  %v1780_v58 = vpack.c.bf16 %v1770_v33, %v1770_v33  ;;  %v1774_v50 = vmul.f32 0.015625, %v1681_v45  ;;  %v3954_v45 = vld [vmem:[#allocation7 + $0x1e8] sm:$0xff]  }
 0x1b9   : > { %v1781_v61 = vpack.c.bf16 %v1771_v35, %v1771_v35  ;;  %v1775_v56 = vmul.f32 0.015625, %v1683_v47  ;;  %v1685_v57 = vpop.f32.mrb[42].mxu0  ;;  %v3953_v35 = vld [vmem:[#allocation7 + $0x200] sm:$0xff]   ;;  %v3955_v46 = vld [vmem:[#allocation7 + $0x248] sm:$0xff]  }
 0x1ba   : > { %v1686_v6 = vpop.f32.mrb[43].mxu0  ;;  %v1784_v32 = vpack.c.bf16 %v1774_v50, %v1774_v50  ;;  %v3959_v57 = vld [vmem:[#allocation7 + $0x250] sm:$0xff]  }
 0x1bb   : > { %2462 = vmatprep.mubr.bf16.mxu1 %v1781_v61  ;;  %v1785_v0 = vpack.c.bf16 %v1775_v56, %v1775_v56  ;;  %v3956_v61 = vld [vmem:[#allocation7 + $0x1a8] sm:$0xff]   ;;  %v3958_v56 = vld [vmem:[#allocation7 + $0x1f0] sm:$0xff]   ;;  %v3962_v6 = vld [vmem:[#allocation7 + $0x1f8] sm:$0xff]  }
 0x1bc   : > { %2463 = vmatmul.mubr.bf16.vlgmr.msra.gmra.mrb[52].mxu1 %v1780_v58  ;;  %v3960_v58 = vld [vmem:[#allocation7 + $0x1b0] sm:$0xff]  }
 0x1bd   : > { %3533 = vmatpush3.bf16.msra.mxu1 %v3921_v1  ;;  %2542 = vmatprep.mubr.bf16.mxu1 %v1785_v0  ;;  %v3957_v1 = vld [vmem:[#allocation7 + $0x208] sm:$0xff]   ;;  %v3963_v0 = vld [vmem:[#allocation7 + $0x258] sm:$0xff]  }
 0x1be   : > { %3534 = vmatprep.subr.bf16.mxu1 %v3923_v4  ;;  %v3961_v4 = vld [vmem:[#allocation7 + $0x210] sm:$0xff]  }
 0x1c1   : > { %3535 = vmatpush3.bf16.msra.mxu1 %v3925_v3 }
 0x1c2   : > { %3536 = vmatprep.subr.bf16.mxu1 %v3927_v7  ;;  %v3964_v7 = vld [vmem:[#allocation7 + $0x1b8] sm:$0xff]  }
 0x1c5   : > { %3537 = vmatpush3.bf16.msra.mxu1 %v3929_v8  ;;  %v1640_v10 = vpop.f32.mrb[44].mxu1  ;;  %v3965_v8 = vld [vmem:[#allocation7 + $0x218] sm:$0xff]  }
 0x1c6   : > { %v1772_v12 = vmul.f32 0.015625, %v1640_v10  ;;  %v1642_v13 = vpop.f32.mrb[45].mxu1  ;;  %3538 = vmatprep.subr.bf16.mxu1 %v3931_v9  ;;  %v3966_v9 = vld [vmem:[#allocation7 + $0x260] sm:$0xff]  }
 0x1c7   : > { %v1773_v15 = vmul.f32 0.015625, %v1642_v13  ;;  %v1644_v17 = vpop.f32.mrb[46].mxu1  ;;  %v4575_v59 = vpop.f32.mrb[44].mxu0  ;;  %v3969_v13 = vld [vmem:[#allocation7 + $0x228] sm:$0xff]  }
 0x1c8   : > { %v1782_v18 = vpack.c.bf16 %v1772_v12, %v1772_v12  ;;  %v1645_v20 = vpop.f32.mrb[47].mxu1  ;;  %v1765_v21 = vpop.f32.mrb[45].mxu0  ;;  %v3968_v12 = vld [vmem:[#allocation7 + $0x268] sm:$0xff]   ;;  %v3972_v17 = vld [vmem:[#allocation7 + $0x278] sm:$0xff]  }
 0x1c9   : > { %v1783_v22 = vpack.c.bf16 %v1773_v15, %v1773_v15  ;;  %3539 = vmatpush3.bf16.msra.mxu1 %v3933_v11  ;;  %v1767_v24 = vpop.f32.mrb[46].mxu0  ;;  %v1779_v49 = vmul.f32 0.015625, %v1765_v21  ;;  %v3967_v11 = vld [vmem:[#allocation7 + $0x220] sm:$0xff]   ;;  %v3971_v15 = vld [vmem:[#allocation7 + $0x230] sm:$0xff]   ;;  %v1778_v20 = vmul.f32 0.015625, %v4575_v59 }
 0x1ca   : > { %3540 = vmatprep.subr.bf16.mxu1 %v3934_v14  ;;  %v1768_v27 = vpop.f32.mrb[47].mxu0  ;;  %v3970_v14 = vld [vmem:[#allocation7 + $0x270] sm:$0xff]   ;;  %v3976_v59 = vld [vmem:[%s345_s2] sm:$0xff]   ;;  %v3978_v24 = vld [vmem:[%s345_s2 + $0x8] sm:$0xff]  }
 0x1cb   : > { %2502 = vmatprep.mubr.bf16.mxu0 %v1783_v22  ;;  %v1789_v47 = vpack.c.bf16 %v1779_v49, %v1779_v49  ;;  %v1788_v21 = vpack.c.bf16 %v1778_v20, %v1778_v20  ;;  %v3974_v22 = vld [vmem:[%s4684_s5] sm:$0xff]   ;;  %v3981_v27 = vld [vmem:[%s4683_s4 + $0x18] sm:$0xff]  }
 0x1cc   : > { %2503 = vmatmul.mubr.bf16.vlgmr.msra.gmra.mrb[48].mxu0 %v1782_v18  ;;  %v3973_v18 = vld [vmem:[#allocation7 + $0x238] sm:$0xff]  }
 0x1cd   : > { %3541 = vmatpush3.bf16.msra.mxu1 %v3936_v23  ;;  %3555 = vmatpush3.bf16.msra.mxu0 %v3937_v5  ;;  %v3975_v23 = vld [vmem:[%s4684_s5 + $0x8] sm:$0xff]   ;;  %v3977_v5 = vld [vmem:[%s4683_s4] sm:$0xff]  }
 0x1ce   : > { %3542 = vmatprep.subr.bf16.mxu1 %v3938_v25  ;;  %3556 = vmatprep.subr.bf16.mxu0 %v3939_v26  ;;  %v3979_v25 = vld [vmem:[%s4683_s4 + $0x8] sm:$0xff]   ;;  %v3980_v26 = vld [vmem:[%s4683_s4 + $0x10] sm:$0xff]  }
 0x1d1   : > { %3543 = vmatpush3.bf16.msra.mxu1 %v3940_v28  ;;  %3557 = vmatpush3.bf16.msra.mxu0 %v3941_v29  ;;  %v3982_v28 = vld [vmem:[%s4683_s4 + $0x20] sm:$0xff]   ;;  %v3983_v29 = vld [vmem:[%s4683_s4 + $0x28] sm:$0xff]  }
 0x1d2   : > { %3544 = vmatprep.subr.bf16.mxu1 %v3942_v30  ;;  %3558 = vmatprep.subr.bf16.mxu0 %v3943_v16  ;;  %v3984_v30 = vld [vmem:[%s345_s2 + $0x10] sm:$0xff]   ;;  %v3985_v16 = vld [vmem:[%s345_s2 + $0x18] sm:$0xff]   ;;  %s3053_s2 = sshll.u32 %s4374_s14, 6 }
 0x1d3   : > { %s340_s30 = scalar_lea.vmem [#allocation8], %s3053_s2 }
 0x1d4   : > { %s2940_s9 = sshll.u32 %s340_s30, 4  ;;  %s4630_s9 = int_to_ptr.vmem [resolvable:$true] %s2940_s9 }
 0x1d5   : > { %3545 = vmatpush3.bf16.msra.mxu1 %v3944_v37  ;;  %3559 = vmatpush3.bf16.msra.mxu0 %v3945_v40  ;;  %v1722_v53 = vpop.f32.mrb[48].mxu1  ;;  %v3986_v37 = vld [vmem:[%s4683_s4 + $0x30] sm:$0xff]   ;;  %v3987_v40 = vld [vmem:[%s4683_s4 + $0x38] sm:$0xff]   ;;  %s4078_s19 = scalar_lea.vmem %s4630_s9, 1024  ;;  %p4085_p9 = scmp.lt.s32.totalorder %s4630_s9, %s4083_s12 }
 0x1d6   : > { %3546 = vmatprep.subr.bf16.mxu1 %v3946_v42  ;;  %3560 = vmatprep.subr.bf16.mxu0 %v3947_v48  ;;  %v1724_v36 = vpop.f32.mrb[49].mxu1  ;;  %v1776_v3 = vmul.f32 0.015625, %v1722_v53  ;;  %p4079_p0 = scmp.ne.s32.totalorder %s4630_s9, %s4078_s19  ;;  %p4086_p12 = scmp.lt.s32.totalorder %s4084_s15, %s4078_s19 }
 0x1d7   : > { %v1777_v60 = vmul.f32 0.015625, %v1724_v36  ;;  %v1726_v62 = vpop.f32.mrb[50].mxu1 }
 0x1d8   : > { %v1727_v33 = vpop.f32.mrb[51].mxu1  ;;  %v1786_v10 = vpack.c.bf16 %v1776_v3, %v1776_v3  ;;  %p4080_p3 = pnand %p4079_p0, %p4702_p1  ;;  %p4087_p2 = por %p4086_p12, %p4085_p9 }
 0x1d9   : > { %3547 = vmatpush3.bf16.msra.mxu1 %v3948_v51  ;;  %3561 = vmatpush3.bf16.msra.mxu0 %v3949_v52  ;;  %v1787_v44 = vpack.c.bf16 %v1777_v60, %v1777_v60 }
 0x1da   : > { %3562 = vmatprep.subr.bf16.mxu0 %v3950_v54  ;;  %3576 = vmatprep.subr.bf16.mxu1 %v3951_v55  ;;  %p4081_p7 = pneg %p4080_p3 }
 0x1db   : > { %2582 = vmatprep.mubr.bf16.mxu0 %v1787_v44 }
 0x1dc   : > { %2543 = vmatmul.mubr.bf16.vlgmr.msra.gmra.mrb[56].mxu1 %v1784_v32  ;;  %p4088_p13 = pnand %p4087_p2, %p4081_p7 }
 0x1dd   : > { %3563 = vmatpush3.bf16.msra.mxu0 %v3952_v34  ;;  %3577 = vmatpush3.bf16.msra.mxu1 %v3953_v35 }
 0x1de   : > { %3564 = vmatprep.subr.bf16.mxu0 %v3954_v45  ;;  %3578 = vmatprep.subr.bf16.mxu1 %v3955_v46 }
 0x1df   : > { %2622 = vmatprep.mubr.bf16.mxu1 %v1789_v47 }
 0x1e1   : > { %3565 = vmatpush3.bf16.msra.mxu0 %v3956_v61  ;;  %3579 = vmatpush3.bf16.msra.mxu1 %v3957_v1 }
 0x1e2   : > { %3566 = vmatprep.subr.bf16.mxu0 %v3958_v56  ;;  %3580 = vmatprep.subr.bf16.mxu1 %v3959_v57 }
 0x1e5   : > { %3567 = vmatpush3.bf16.msra.mxu0 %v3960_v58  ;;  %3581 = vmatpush3.bf16.msra.mxu1 %v3961_v4 }
 0x1e6   : > { %3568 = vmatprep.subr.bf16.mxu0 %v3962_v6  ;;  %3582 = vmatprep.subr.bf16.mxu1 %v3963_v0 }
 0x1e9   : > { %3569 = vmatpush3.bf16.msra.mxu0 %v3964_v7  ;;  %3583 = vmatpush3.bf16.msra.mxu1 %v3965_v8 }
 0x1ea   : > { %3584 = vmatprep.subr.bf16.mxu1 %v3966_v9  ;;  %3616 = vmatprep.subr.bf16.mxu0 %v3974_v22 }
 0x1ec   : > { %2583 = vmatmul.mubr.bf16.vlgmr.msra.gmra.mrb[52].mxu0 %v1786_v10  ;;  %v2636_v10 = vlaneseq }
 0x1ed   : > { %3585 = vmatpush3.bf16.msra.mxu1 %v3967_v11  ;;  %3617 = vmatpush3.bf16.msra.mxu0 %v3974_v22  ;;  %v1558_v22 = vmax.f32 %v4564_v41, 0.0 }
 0x1ee   : > { %3586 = vmatprep.subr.bf16.mxu1 %v3968_v12  ;;  %3618 = vmatprep.subr.bf16.mxu0 %v3975_v23  ;;  %v2637_v11 = vshrl.u32 %v2636_v10, 7 }
 0x1ef   : > { %3620 = vmatprep.mubr.msk.bf16.mxu0 %vm2712_vm1, %v3976_v59  ;;  %v1560_v59 = vmax.f32 %v4573_v2, 0.0 }
 0x1f0   : > { %v2638_v12 = vsub.s32 0, %v2637_v11 }
 0x1f1   : > { %3587 = vmatpush3.bf16.msra.mxu1 %v3969_v13  ;;  %3619 = vmatpush3.bf16.msra.mxu0 %v3975_v23  ;;  %v1559_v23 = vmax.f32 %v4568_v63, 0.0 }
 0x1f2   : > { %3588 = vmatprep.subr.bf16.mxu1 %v3970_v14  ;;  %3628 = vmatprep.subr.bf16.mxu0 %v3977_v5  ;;  %v1553_v14 = vmax.f32 %v4557_v31, 0.0 }
 0x1f4   : > { %3621 = vmatmul.mubr.msk.bf16.vlgmr.msra.gmra.mrb[56].mxu0 %vm2712_vm1, %v3978_v24 }
 0x1f5   : > { %3589 = vmatpush3.bf16.msra.mxu1 %v3971_v15  ;;  %3629 = vmatpush3.bf16.msra.mxu0 %v3977_v5  ;;  %v1554_v15 = vmax.f32 %v4562_v19, 0.0 }
 0x1f6   : > { %3590 = vmatprep.subr.bf16.mxu1 %v3972_v17  ;;  %3630 = vmatprep.subr.bf16.mxu0 %v3979_v25  ;;  %v1555_v17 = vmax.f32 %v4566_v43, 0.0 }
 0x1f7   : > { %3624 = vmatprep.mubr.msk.bf16.mxu0 %vm2712_vm1, %v3984_v30 }
 0x1f9   : > { %3591 = vmatpush3.bf16.msra.mxu1 %v3973_v18  ;;  %3631 = vmatpush3.bf16.msra.mxu0 %v3979_v25  ;;  %v1556_v18 = vmax.f32 %v4571_v39, 0.0 }
 0x1fa   : > { %3632 = vmatprep.subr.bf16.mxu0 %v3980_v26 }
 0x1fc   : > { %2623 = vmatmul.mubr.bf16.vlgmr.msra.gmra.mrb[60].mxu1 %v1788_v21  ;;  %3625 = vmatmul.mubr.msk.bf16.gmra.mrb[60].mxu0 %vm2712_vm1, %v3985_v16  ;;  %v1557_v21 = vmax.f32 %v4559_v38, 0.0  ;;  %v3280_v38 = vld [vmem:[%s4685_s6] ss:$0 sm:$0xff] }
 0x1fd   : > { %3633 = vmatpush3.bf16.msra.mxu0 %v3980_v26 }
 0x1fe   : > { %3634 = vmatprep.subr.bf16.mxu0 %v3981_v27 }
 0x201   : > { %3635 = vmatpush3.bf16.msra.mxu0 %v3981_v27 }
 0x202   : > { %3636 = vmatprep.subr.bf16.mxu0 %v3982_v28 }
 0x205   : > { %3637 = vmatpush3.bf16.msra.mxu0 %v3982_v28 }
 0x206   : > { %3638 = vmatprep.subr.bf16.mxu0 %v3983_v29 }
 0x209   : > { %3639 = vmatpush3.bf16.msra.mxu0 %v3983_v29 }
 0x20a   : > { %3640 = vmatprep.subr.bf16.mxu0 %v3986_v37 }
 0x20d   : > { %3641 = vmatpush3.bf16.msra.mxu0 %v3986_v37 }
 0x20e   : > { %3642 = vmatprep.subr.bf16.mxu0 %v3987_v40 }
 0x211   : > { %3643 = vmatpush3.bf16.msra.mxu0 %v3987_v40 }
 0x28f   : > { %v3504_v42 = vpop.f32.mrb[52].mxu1 }
 0x290   : > { %v3505_v48 = vpop.f32.mrb[53].mxu1 }
 0x291   : > { %v3506_v50 = vadd.f32 %v3505_v48, %v3504_v42  ;;  %v3507_v51 = vpop.f32.mrb[54].mxu1 }
 0x292   : > { %v3508_v52 = vpop.f32.mrb[55].mxu1 }
 0x29f   : > { %v3526_v53 = vpop.f32.mrb[48].mxu0 }
 0x2a0   : > { %v3527_v54 = vpop.f32.mrb[49].mxu0 }
 0x2a1   : > { %v3528_v55 = vadd.f32 %v3527_v54, %v3526_v53  ;;  %v3529_v36 = vpop.f32.mrb[50].mxu0 }
 0x2a2   : > { %v3530_v60 = vpop.f32.mrb[51].mxu0 }
 0x2a3   : > { %v2505_v62 = vadd.f32 %v3528_v55, %v3506_v50 }
 0x2af   : > { %v3548_v49 = vpop.f32.mrb[56].mxu1 }
 0x2b0   : > { %v3549_v32 = vpop.f32.mrb[57].mxu1 }
 0x2b1   : > { %v3550_v33 = vadd.f32 %v3549_v32, %v3548_v49  ;;  %v3551_v34 = vpop.f32.mrb[58].mxu1 }
 0x2b2   : > { %v3552_v35 = vpop.f32.mrb[59].mxu1 }
 0x2b3   : > { %v2545_v44 = vadd.f32 %v3550_v33, %v2505_v62 }
 0x2bf   : > { %v3570_v45 = vpop.f32.mrb[52].mxu0 }
 0x2c0   : > { %v3571_v46 = vpop.f32.mrb[53].mxu0 }
 0x2c1   : > { %v3572_v47 = vadd.f32 %v3571_v46, %v3570_v45  ;;  %v3573_v61 = vpop.f32.mrb[54].mxu0 }
 0x2c2   : > { %v3574_v1 = vpop.f32.mrb[55].mxu0 }
 0x2c3   : > { %v2585_v56 = vadd.f32 %v3572_v47, %v2545_v44 }
 0x2cf   : > { %v3592_v57 = vpop.f32.mrb[60].mxu1 }
 0x2d0   : > { %v3593_v58 = vpop.f32.mrb[61].mxu1 }
 0x2d1   : > { %v3594_v4 = vadd.f32 %v3593_v58, %v3592_v57  ;;  %v3595_v6 = vpop.f32.mrb[62].mxu1 }
 0x2d2   : > { %v3596_v0 = vpop.f32.mrb[63].mxu1 }
 0x2d3   : > { %v2625_v3 = vadd.f32 %v3594_v4, %v2585_v56 }
 0x2d5   : > { %v3261_v7 = vmul.f32 -1.442695, %v2625_v3 }
 0x2d7   : > { %3988 = vpow2.f32 %v3261_v7 }
 0x2e1   : > { %v3989_v8 = vpop.eup %3988 }
 0x2e2   : > { %v2633_v9 = vadd.f32 1.0, %v3989_v8 }
 0x2e4   : > { %3990 = vrcp.f32 %v2633_v9 }
 0x2ee   : > { %v3991_v13 = vpop.eup %3990 }
 0x2ef   : > { %v2639_v20 = vrot.slane %v3991_v13, %v2638_v12 }
 0x2f1   : > { %v2640_v5 = vmul.f32 %v2639_v20, %v1553_v14  ;;  %v2641_v24 = vmul.f32 %v2639_v20, %v1554_v15  ;;  %v2642_v25 = vmul.f32 %v2639_v20, %v1555_v17  ;;  %v2643_v31 = vmul.f32 %v2639_v20, %v1556_v18 }
 0x2f2   : > { %v2644_v26 = vmul.f32 %v2639_v20, %v1557_v21  ;;  %v2645_v19 = vmul.f32 %v2639_v20, %v1558_v22  ;;  %v2646_v27 = vmul.f32 %v2639_v20, %v1559_v23  ;;  %v2647_v43 = vmul.f32 %v2639_v20, %v1560_v59 }
 0x2f3   : > { %v2648_v28 = vpack.c.bf16 %v2641_v24, %v2640_v5  ;;  %v2649_v39 = vpack.c.bf16 %v2643_v31, %v2642_v25 }
 0x2f4   : > { %v2650_v29 = vpack.c.bf16 %v2645_v19, %v2644_v26  ;;  %v2651_v30 = vpack.c.bf16 %v2647_v43, %v2646_v27 }
 0x2f5   : > { %3644 = vmatprep.mubr.bf16.mxu0 %v2648_v28 }
 0x2f6   : > { %3645 = vmatmul.mubr.bf16.vlgmr.msra.gmra.mrb[56].mxu0 %v2649_v39 }
 0x2f7   : > { %3648 = vmatprep.mubr.bf16.mxu0 %v2650_v29 }
 0x2fe   : > { %3649 = vmatmul.mubr.bf16.gmra.mrb[60].mxu0 %v2651_v30 }
 0x3c9   : > { %v3646_v41 = vpop.f32.mrb[56].mxu0 }
 0x3ca   : > { %v2912_v63 = vadd.f32 %v3646_v41, %v3280_v38  ;;  %v2872_v2 = vpop.f32.mrb[57].mxu0 }
 0x3cb   : > { %v2910_v16 = vadd.f32 %v3280_v38, %v2872_v2  ;;  %v3647_v37 = vpop.f32.mrb[58].mxu0 }
 0x3cc   : > { %2920 = vst [vmem:[%s340_s30 + $0x10] sm:$0xff] %v2912_v63  ;;  %v2913_v40 = vadd.f32 %v3647_v37, %v3280_v38  ;;  %v2875_v42 = vpop.f32.mrb[59].mxu0 }
 0x3cd   : > { %2918 = vst [vmem:[%s340_s30] sm:$0xff] %v2910_v16  ;;  %v2911_v48 = vadd.f32 %v3280_v38, %v2875_v42 }
 0x3ce   : > { %2921 = vst [vmem:[%s340_s30 + $0x18] sm:$0xff] %v2913_v40 }
 0x3cf   : > { %2919 = vst [vmem:[%s340_s30 + $0x8] sm:$0xff] %v2911_v48 }
 0x3d1   : > { %v3650_v50 = vpop.f32.mrb[60].mxu0 }
 0x3d2   : > { %v2916_v51 = vadd.f32 %v3650_v50, %v3280_v38  ;;  %v2888_v52 = vpop.f32.mrb[61].mxu0 }
 0x3d3   : > { %v2914_v53 = vadd.f32 %v3280_v38, %v2888_v52  ;;  %v3651_v54 = vpop.f32.mrb[62].mxu0 }
 0x3d4   : > { %2924 = vst [vmem:[%s340_s30 + $0x30] sm:$0xff] %v2916_v51  ;;  %v2917_v55 = vadd.f32 %v3651_v54, %v3280_v38  ;;  %v2891_v36 = vpop.f32.mrb[63].mxu0 }
 0x3d5   : > { %2922 = vst [vmem:[%s340_s30 + $0x20] sm:$0xff] %v2914_v53  ;;  %v2915_v60 = vadd.f32 %v3280_v38, %v2891_v36 }
 0x3d6   : > { %2925 = vst [vmem:[%s340_s30 + $0x38] sm:$0xff] %v2917_v55 }
 0x3d7   : > { %2923 = vst [vmem:[%s340_s30 + $0x28] sm:$0xff] %v2915_v60 }
 0x3d8   : > { %4091 = shalt.err (!%p4088_p13)
}
 0x3d9   : > { %s4092_s29 = scalar_lea.hbm %s4635_s10, 1024  ;;  %s4096_s18 = scalar_lea.hbm %s4686_s7, 2048 }
 0x3da   : > { %p4093_p6 = scmp.ne.s32.totalorder %s4635_s10, %s4092_s29  ;;  %p4097_p5 = scmp.lt.u32.totalorder %s4635_s10, %s4686_s7 }
 0x3db   : > { %p4098_p8 = scmp.lt.u32.totalorder %s4096_s18, %s4092_s29  ;;  %p4100_p0 = scmp.lt.u32.totalorder %s4092_s29, %s4635_s10 }
 0x3dc   : > { %p4094_p10 = pnand %p4093_p6, %p4702_p1 }
 0x3dd   : > { %p4099_p11 = por %p4098_p8, %p4097_p5 }
 0x3de   : > { %p4095_p4 = pneg %p4094_p10 }
 0x3df   : > { %p4101_p3 = por %p4100_p0, %p4099_p11 }
 0x3e1   : > { %p4102_p7 = pnand %p4101_p3, %p4095_p4 }
 0x3e3   : > { %4105 = shalt.err (!%p4102_p7)
}
 0x3e4   : > { %s4160_s21 = smov 128   ;;  %s4161_s22 = smov 8  }
 0x3e5   : > { %3689 = dma.vmem_to_hbm [thread:$0]  (%p4702_p1), %s4630_s9, 1024, %s4635_s10, %s2927_s28, %s4160_s21, %s4160_s21, %s4161_s22  }
 0x3e6 PF: > { %s2955_s19 = sand.u32 1, %s4136_s24   ;;  %p4703_p9 = scmp.ne.s32.totalorder %s4692_s8, 0 }
 0x3e7   : > { %p4704_p12 = scmp.ge.s32.totalorder %s4148_s27, 2  ;;  %s2956_s11 = scalar_lea.sflag [#allocation4], %s2955_s19 }
 0x3e9   : > { %p3703_p2 = pnand %p4704_p12, %p4703_p9 }
 0x3eb   : > { %4131 = dma.done.wait (!%p3703_p2), %s2956_s11, 1024  }
 0x3ec   : > { %4133 = vsyncadd (!%p3703_p2), %s2956_s11, 4294966272  ;;  %p21_p13 = scmp.ge.s32.totalorder %s4312_s13, 4   ;;  %s4705_s24 = smov %s4140_s25 }
 0x3ed   : > { %s4706_s25 = smov %s4144_s26  ;;  %s4707_s26 = smov %s4328_s17 }
 0x3ee   : > { %s4708_s27 = smov %s4312_s13  ;;  %23 = sbr.rel (!%p21_p13) target bundleno = 8 (0x8), region = 104 }
 0x3f5   :  { %2961 = vsyncpa [#allocation3], 1 }
 0x3f6   :  { %2963 = vsyncpa [#allocation3 + $0x1], 1 }
 0x3f7   :  { %2964 = vsyncpa [#allocation6], 1 }
 0x3f8   :  { %2965 = vsyncpa [#allocation4], 1 }
 0x3f9   :  { %2967 = vsyncpa [#allocation4 + $0x1], 1 }

</bundles_post_ra>
